<compile_context>
chip_gen: v6e
topology: v6e:2x2x1
jax: 0.10.0
libtpu: 0.0.40
codegen_flags: <defaults>
</compile_context>

<pallas_src>
import functools

import jax
import jax.numpy as jnp
from jax.experimental import pallas as pl
from jax.experimental.pallas import tpu as pltpu

TILE_M = 512                       # rows per grid step (fits v5e/v6e/v7x VMEM budgets)
VMEM_LIMIT_BYTES = 48 * 1024 * 1024


def _round_up(x, m):
    return (x + m - 1) // m * m


def _pick_tile(m):
    # bf16 sublane packing -> keep row tiles multiples of 16 (or the full padded dim).
    return min(TILE_M, _round_up(m, 16))


def _pad_rows(x, m_pad):
    m = x.shape[0]
    return x if m_pad == m else jnp.pad(x, ((0, m_pad - m), (0, 0)))


def _apply_act(x, act):
    if act == "leaky_relu":
        return jnp.where(x >= 0, x, 0.2 * x)
    if act == "relu":
        return jnp.maximum(x, 0.0)
    if act == "sigmoid":
        return jax.nn.sigmoid(x)
    return x


def _compiler_params():
    return pltpu.CompilerParams(
        dimension_semantics=("parallel",),
        vmem_limit_bytes=VMEM_LIMIT_BYTES,
    )


# ---------------------------------------------------------------------------
# Pallas kernels
# ---------------------------------------------------------------------------
def _matmul_act_kernel(x_ref, w_ref, o_ref, *, act):
    """o = act(x @ w) for one (TILE_M, K) x (K, N) tile; bf16 operands, f32 accumulate."""
    acc = jnp.dot(x_ref[...], w_ref[...], preferred_element_type=jnp.float32)
    o_ref[...] = _apply_act(acc, act).astype(o_ref.dtype)


def _matmul_stats_kernel(x_ref, w_ref, o_ref, sum_ref, sq_ref):
    """o = x @ w, plus per-tile column sum / sum-of-squares (BN stats fused into conv pass)."""
    acc = jnp.dot(x_ref[...], w_ref[...], preferred_element_type=jnp.float32)
    o_ref[...] = acc.astype(o_ref.dtype)
    s = jnp.sum(acc, axis=0, keepdims=True)             # (1, N)
    sq = jnp.sum(acc * acc, axis=0, keepdims=True)      # (1, N)
    sum_ref[...] = jnp.broadcast_to(s, sum_ref.shape)   # (8, N) tile, row-replicated
    sq_ref[...] = jnp.broadcast_to(sq, sq_ref.shape)


def _scale_bias_act_kernel(x_ref, s_ref, b_ref, o_ref, *, act):
    """y = act(x * scale + bias) — the BN normalize + activation pass (f32 math)."""
    y = x_ref[...].astype(jnp.float32) * s_ref[...] + b_ref[...]
    o_ref[...] = _apply_act(y, act).astype(o_ref.dtype)


# ---------------------------------------------------------------------------
# Tiled pallas_call wrappers
# ---------------------------------------------------------------------------
def matmul_act(patches, w2d, act, out_dtype):
    m, k = patches.shape
    n = w2d.shape[1]
    tile = _pick_tile(m)
    m_pad = _round_up(m, tile)
    xp = _pad_rows(patches, m_pad)
    grid_m = m_pad // tile
    y = pl.pallas_call(
        functools.partial(_matmul_act_kernel, act=act),
        out_shape=jax.ShapeDtypeStruct((m_pad, n), out_dtype),
        grid=(grid_m,),
        in_specs=[
            pl.BlockSpec((tile, k), lambda i: (i, 0)),
            pl.BlockSpec((k, n), lambda i: (0, 0)),
        ],
        out_specs=pl.BlockSpec((tile, n), lambda i: (i, 0)),
        compiler_params=_compiler_params(),
    )(xp, w2d)
    return y[:m]


def matmul_stats(patches, w2d, out_dtype):
    """Returns (y_padded, col_sum, col_sumsq).  Padded rows are zero -> stats unaffected."""
    m, k = patches.shape
    n = w2d.shape[1]
    tile = _pick_tile(m)
    m_pad = _round_up(m, tile)
    xp = _pad_rows(patches, m_pad)
    grid_m = m_pad // tile
    y, psum, psq = pl.pallas_call(
        _matmul_stats_kernel,
        out_shape=(
            jax.ShapeDtypeStruct((m_pad, n), out_dtype),
            jax.ShapeDtypeStruct((grid_m * 8, n), jnp.float32),
            jax.ShapeDtypeStruct((grid_m * 8, n), jnp.float32),
        ),
        grid=(grid_m,),
        in_specs=[
            pl.BlockSpec((tile, k), lambda i: (i, 0)),
            pl.BlockSpec((k, n), lambda i: (0, 0)),
        ],
        out_specs=(
            pl.BlockSpec((tile, n), lambda i: (i, 0)),
            pl.BlockSpec((8, n), lambda i: (i, 0)),
            pl.BlockSpec((8, n), lambda i: (i, 0)),
        ),
        compiler_params=_compiler_params(),
    )(xp, w2d)
    col_sum = psum.reshape(grid_m, 8, n)[:, 0, :].sum(axis=0)
    col_sq = psq.reshape(grid_m, 8, n)[:, 0, :].sum(axis=0)
    return y, col_sum, col_sq


def scale_bias_act(y, scale, bias, act, out_dtype):
    m, c = y.shape
    tile = _pick_tile(m)
    m_pad = _round_up(m, tile)
    yp = _pad_rows(y, m_pad)
    grid_m = m_pad // tile
    s2 = scale.reshape(1, c).astype(jnp.float32)
    b2 = bias.reshape(1, c).astype(jnp.float32)
    out = pl.pallas_call(
        functools.partial(_scale_bias_act_kernel, act=act),
        out_shape=jax.ShapeDtypeStruct((m_pad, c), out_dtype),
        grid=(grid_m,),
        in_specs=[
            pl.BlockSpec((tile, c), lambda i: (i, 0)),
            pl.BlockSpec((1, c), lambda i: (0, 0)),
            pl.BlockSpec((1, c), lambda i: (0, 0)),
        ],
        out_specs=pl.BlockSpec((tile, c), lambda i: (i, 0)),
        compiler_params=_compiler_params(),
    )(yp, s2, b2)
    return out[:m]


# ---------------------------------------------------------------------------
# JAX glue: im2col, phase decomposition, pixel shuffle, BN scale/bias
# ---------------------------------------------------------------------------
def _im2col_conv(x, k=4, stride=2, pad=1):
    """Patches for Conv2d(k=4,s=2,p=1): (N*OH*OW, k*k*C), patch order (kh, kw, cin)."""
    n, h, w, c = x.shape
    xp = jnp.pad(x, ((0, 0), (pad, pad), (pad, pad), (0, 0)))
    oh = (h + 2 * pad - k) // stride + 1
    ow = (w + 2 * pad - k) // stride + 1
    cols = [xp[:, kh:kh + stride * oh:stride, kw:kw + stride * ow:stride, :]
            for kh in range(k) for kw in range(k)]
    patches = jnp.concatenate(cols, axis=-1)                # (N, OH, OW, k*k*C)
    return patches.reshape(n * oh * ow, k * k * c), (n, oh, ow)


def _im2col_phase(x):
    """3x3-window, stride-1 patches over the pad-1 input: (N*H*W, 9*C), order (dy, dx, cin)."""
    n, h, w, c = x.shape
    xp = jnp.pad(x, ((0, 0), (1, 1), (1, 1), (0, 0)))
    cols = [xp[:, dy:dy + h, dx:dx + w, :] for dy in range(3) for dx in range(3)]
    patches = jnp.concatenate(cols, axis=-1)                # (N, H, W, 9*C)
    return patches.reshape(n * h * w, 9 * c), (n, h, w)


def _pixel_shuffle_2x(y, n, h, w, cout):
    """y: (N*H*W, 4*Cout) with column order (a, b, cout) -> (N, 2H, 2W, Cout)."""
    y6 = y.reshape(n, h, w, 2, 2, cout)
    return jnp.transpose(y6, (0, 1, 3, 2, 4, 5)).reshape(n, 2 * h, 2 * w, cout)


def _bn_scale_bias(col_sum, col_sq, count, gamma, beta, eps=1e-5):
    mean = col_sum / count
    var = jnp.maximum(col_sq / count - mean * mean, 0.0)    # biased batch variance
    scale = gamma * jax.lax.rsqrt(var + eps)
    bias = beta - mean * scale
    return scale, bias


# Weight pre-layout (done once at init, bf16)
def _conv_w2d(w_oihw):
    """nn.Conv2d weight (Cout, Cin, 4, 4) -> (16*Cin, Cout) matching (kh, kw, cin) patches."""
    cout, cin, k, _ = w_oihw.shape
    return jnp.transpose(w_oihw, (2, 3, 1, 0)).reshape(k * k * cin, cout).astype(jnp.bfloat16)


# For ConvTranspose2d(4,2,1): out[2m+a, 2n+b] uses input rows {m-1,m} (a=0) / {m,m+1} (a=1)
# with kernel taps ky={3,1} / {2,0}; same for columns.  Encode as one (9*Cin, 4*Cout) matrix
# over a 3x3 input window (5 of 9 taps are zero per phase).
_PHASE_TAPS = ({0: 3, 1: 1}, {1: 2, 2: 0})   # phase a -> {window dy: kernel ky}


def _deconv_phase_w2d(w_iohw):
    """nn.ConvTranspose2d weight (Cin, Cout, 4, 4) -> (9*Cin, 4*Cout) phase matrix."""
    cin, cout, _, _ = w_iohw.shape
    w2d = jnp.zeros((9, cin, 4, cout), jnp.float32)
    for a in range(2):
        for b in range(2):
            for dy, ky in _PHASE_TAPS[a].items():
                for dx, kx in _PHASE_TAPS[b].items():
                    w2d = w2d.at[dy * 3 + dx, :, a * 2 + b, :].set(w_iohw[:, :, ky, kx])
    return w2d.reshape(9 * cin, 4 * cout).astype(jnp.bfloat16)


# ---------------------------------------------------------------------------
# Forward pass (jitted)
# ---------------------------------------------------------------------------
@jax.jit
def _generator_forward(params, x_nchw):
    x = jnp.transpose(x_nchw, (0, 2, 3, 1)).astype(jnp.bfloat16)   # NCHW -> NHWC, bf16

    # Conv(4,2,1) -> LeakyReLU(0.2)   (activation fused in the matmul epilogue)
    w2d = params["conv_w2d"][0]
    patches, (n, oh, ow) = _im2col_conv(x)
    y = matmul_act(patches, w2d, act="leaky_relu", out_dtype=jnp.bfloat16)
    x = y.reshape(n, oh, ow, w2d.shape[1])

    # [Conv -> BatchNorm -> LeakyReLU(0.2)]  (BN stats fused into the conv pass)
    for w2d, (g, b) in zip(params["conv_w2d"][1:], params["conv_bn"]):
        patches, (n, oh, ow) = _im2col_conv(x)
        m = patches.shape[0]
        y_pad, cs, csq = matmul_stats(patches, w2d, out_dtype=jnp.bfloat16)
        scale, bias = _bn_scale_bias(cs, csq, float(m), g, b)
        out = scale_bias_act(y_pad, scale, bias, act="leaky_relu", out_dtype=jnp.bfloat16)
        x = out[:m].reshape(n, oh, ow, w2d.shape[1])

    # [ConvT(4,2,1) -> BatchNorm -> ReLU]  (sub-pixel phase decomposition)
    for w2d, (g, b) in zip(params["deconv_w2d"], params["deconv_bn"]):
        cout = g.shape[0]
        patches, (n, h, w) = _im2col_phase(x)
        m = patches.shape[0]
        y_pad, cs4, csq4 = matmul_stats(patches, w2d, out_dtype=jnp.bfloat16)
        cs = cs4.reshape(4, cout).sum(axis=0)           # per-channel stats across 4 phases
        csq = csq4.reshape(4, cout).sum(axis=0)
        scale, bias = _bn_scale_bias(cs, csq, 4.0 * m, g, b)
        out = scale_bias_act(y_pad, jnp.tile(scale, 4), jnp.tile(bias, 4),
                             act="relu", out_dtype=jnp.bfloat16)
        x = _pixel_shuffle_2x(out[:m], n, h, w, cout)

    # final ConvT(4,2,1) -> Sigmoid  (fused, f32 output)
    w2d = params["final_w2d"]
    cout = w2d.shape[1] // 4
    patches, (n, h, w) = _im2col_phase(x)
    y = matmul_act(patches, w2d, act="sigmoid", out_dtype=jnp.float32)
    out = _pixel_shuffle_2x(y, n, h, w, cout)
    return jnp.transpose(out, (0, 3, 1, 2))              # NHWC -> NCHW


# ---------------------------------------------------------------------------
# GeneratorCNN wrapper
# ---------------------------------------------------------------------------
class GeneratorCNNPallas:
    def __init__(self, input_channel, output_channel, conv_dims, deconv_dims, key):
        conv_dims = list(conv_dims)
        deconv_dims = list(deconv_dims)
        keys = iter(jax.random.split(key, len(conv_dims) + len(deconv_dims) + 1))

        def w_init(k, shape, fan_in):
            s = 1.0 / jnp.sqrt(fan_in)
            return jax.random.uniform(k, shape, jnp.float32, -s, s)

        conv_w2d, conv_bn = [], []
        prev = input_channel
        for i, out_dim in enumerate(conv_dims):
            w = w_init(next(keys), (out_dim, prev, 4, 4), prev * 16)
            conv_w2d.append(_conv_w2d(w))                 # pre-laid-out bf16, once
            if i > 0:                                     # first conv has no BatchNorm
                conv_bn.append((jnp.ones((out_dim,), jnp.float32),
                                jnp.zeros((out_dim,), jnp.float32)))
            prev = out_dim

        deconv_w2d, deconv_bn = [], []
        for out_dim in deconv_dims:
            w = w_init(next(keys), (prev, out_dim, 4, 4), prev * 16)
            deconv_w2d.append(_deconv_phase_w2d(w))
            deconv_bn.append((jnp.ones((out_dim,), jnp.float32),
                              jnp.zeros((out_dim,), jnp.float32)))
            prev = out_dim

        w = w_init(next(keys), (prev, output_channel, 4, 4), prev * 16)
        final_w2d = _deconv_phase_w2d(w)

        self.params = {
            "conv_w2d": conv_w2d, "conv_bn": conv_bn,
            "deconv_w2d": deconv_w2d, "deconv_bn": deconv_bn,
            "final_w2d": final_w2d,
        }

    def __call__(self, x_nchw, y_nchw=None):
        if y_nchw is not None:
            x_nchw = jnp.concatenate([x_nchw, y_nchw], axis=1)   # torch.cat(dim=1)
        return _generator_forward(self.params, x_nchw)


# ---------------------------------------------------------------------------
if __name__ == "__main__":
    key = jax.random.PRNGKey(0)
    k_x, k_params = jax.random.split(key)

    # small config: batch=2, input_channel=4, H=W=16, conv_dims=[8,16], deconv_dims=[16,8]
    batch, in_ch, out_ch, H, W = 2, 4, 3, 16, 16
    conv_dims, deconv_dims = [8, 16], [16, 8]

    x = jax.random.normal(k_x, (batch, in_ch, H, W), jnp.float32)   # NCHW like PyTorch

    model = GeneratorCNNPallas(in_ch, out_ch, conv_dims, deconv_dims, k_params)

    y = model(x)
    y = jax.block_until_ready(y)

    # conv halves spatial twice (16->8->4), deconv doubles three times (4->8->16->32)
    expected = (batch, out_ch, 32, 32)
    assert y.shape == expected, (y.shape, expected)
    assert y.dtype == jnp.float32
    assert bool(jnp.all(jnp.isfinite(y)))
    assert bool(jnp.all(y >= 0.0)) and bool(jnp.all(y <= 1.0))      # sigmoid output

    print("KERNEL_OK")
</pallas_src>

<mosaic_0001>
module attributes {stable_mosaic.version = 11 : i64} {
  func.func @_matmul_act_kernel(%arg0: i32, %arg1: memref<128x64xbf16, #tpu.memory_space<vmem>>, %arg2: memref<64x8xbf16, #tpu.memory_space<vmem>>, %arg3: memref<128x8xbf16, #tpu.memory_space<vmem>>) attributes {dimension_semantics = [#tpu.dimension_semantics<parallel>], iteration_bounds = array<i64: 1>, scalar_prefetch = 0 : i64, scratch_operands = 0 : i64, tpu.core_type = #tpu.core_type<tc>, window_params = [{transform_indices = @transform_0, window_bounds = array<i64: 128, 64>}, {pipeline_mode = #tpu.pipeline_mode<synchronous>, transform_indices = @transform_1, window_bounds = array<i64: 64, 8>}, {transform_indices = @transform_2, window_bounds = array<i64: 128, 8>}]} {
    %c0 = arith.constant 0 : index
    %c0_0 = arith.constant 0 : index
    %0 = vector.load %arg1[%c0, %c0_0] : memref<128x64xbf16, #tpu.memory_space<vmem>>, vector<128x64xbf16>
    %c0_1 = arith.constant 0 : index
    %c0_2 = arith.constant 0 : index
    %1 = vector.load %arg2[%c0_1, %c0_2] : memref<64x8xbf16, #tpu.memory_space<vmem>>, vector<64x8xbf16>
    %cst = arith.constant dense<0.000000e+00> : vector<128x8xf32>
    %2 = tpu.matmul %0, %1, %cst {dimension_numbers = #tpu.dot_dimension_numbers<[1], [0], [0], [1], [0, 0, 1, 1], [], []>} : vector<128x64xbf16>, vector<64x8xbf16>, vector<128x8xf32> -> vector<128x8xf32>
    %cst_3 = arith.constant 0.000000e+00 : f32
    %3 = vector.broadcast %cst_3 : f32 to vector<128x8xf32>
    %4 = arith.cmpf oge, %2, %3 : vector<128x8xf32>
    %cst_4 = arith.constant 2.000000e-01 : f32
    %5 = vector.broadcast %cst_4 : f32 to vector<128x8xf32>
    %6 = arith.mulf %5, %2 : vector<128x8xf32>
    %7 = arith.select %4, %2, %6 : vector<128x8xi1>, vector<128x8xf32>
    %8 = arith.truncf %7 : vector<128x8xf32> to vector<128x8xbf16>
    %c0_5 = arith.constant 0 : index
    %c0_6 = arith.constant 0 : index
    %9 = vector.load %arg3[%c0_5, %c0_6] : memref<128x8xbf16, #tpu.memory_space<vmem>>, vector<128x8xbf16>
    tpu.vector_store %arg3[%c0_5, %c0_6], %8 {strides = array<i32>} : memref<128x8xbf16, #tpu.memory_space<vmem>>, vector<128x8xbf16>,
    return
  }
  func.func @transform_0(%arg0: i32) -> (i32, i32) {
    %c0_i32 = arith.constant 0 : i32
    %c0_i32_0 = arith.constant 0 : i32
    return %arg0, %c0_i32 : i32, i32
  }
  func.func @transform_1(%arg0: i32) -> (i32, i32) {
    %c0_i32 = arith.constant 0 : i32
    %c0_i32_0 = arith.constant 0 : i32
    %c0_i32_1 = arith.constant 0 : i32
    return %c0_i32, %c0_i32_0 : i32, i32
  }
  func.func @transform_2(%arg0: i32) -> (i32, i32) {
    %c0_i32 = arith.constant 0 : i32
    %c0_i32_0 = arith.constant 0 : i32
    return %arg0, %c0_i32 : i32, i32
  }
}

module attributes {stable_mosaic.version = 11 : i64} {
  func.func @_matmul_stats_kernel(%arg0: i32, %arg1: memref<32x128xbf16, #tpu.memory_space<vmem>>, %arg2: memref<128x16xbf16, #tpu.memory_space<vmem>>, %arg3: memref<32x16xbf16, #tpu.memory_space<vmem>>, %arg4: memref<8x16xf32, #tpu.memory_space<vmem>>, %arg5: memref<8x16xf32, #tpu.memory_space<vmem>>) attributes {dimension_semantics = [#tpu.dimension_semantics<parallel>], iteration_bounds = array<i64: 1>, scalar_prefetch = 0 : i64, scratch_operands = 0 : i64, tpu.core_type = #tpu.core_type<tc>, window_params = [{transform_indices = @transform_0, window_bounds = array<i64: 32, 128>}, {pipeline_mode = #tpu.pipeline_mode<synchronous>, transform_indices = @transform_1, window_bounds = array<i64: 128, 16>}, {transform_indices = @transform_2, window_bounds = array<i64: 32, 16>}, {transform_indices = @transform_3, window_bounds = array<i64: 8, 16>}, {transform_indices = @transform_4, window_bounds = array<i64: 8, 16>}]} {
    %c0 = arith.constant 0 : index
    %c0_0 = arith.constant 0 : index
    %0 = vector.load %arg1[%c0, %c0_0] : memref<32x128xbf16, #tpu.memory_space<vmem>>, vector<32x128xbf16>
    %c0_1 = arith.constant 0 : index
    %c0_2 = arith.constant 0 : index
    %1 = vector.load %arg2[%c0_1, %c0_2] : memref<128x16xbf16, #tpu.memory_space<vmem>>, vector<128x16xbf16>
    %cst = arith.constant dense<0.000000e+00> : vector<32x16xf32>
    %2 = tpu.matmul %0, %1, %cst {dimension_numbers = #tpu.dot_dimension_numbers<[1], [0], [0], [1], [0, 0, 1, 1], [], []>} : vector<32x128xbf16>, vector<128x16xbf16>, vector<32x16xf32> -> vector<32x16xf32>
    %3 = arith.truncf %2 : vector<32x16xf32> to vector<32x16xbf16>
    %c0_3 = arith.constant 0 : index
    %c0_4 = arith.constant 0 : index
    %4 = vector.load %arg3[%c0_3, %c0_4] : memref<32x16xbf16, #tpu.memory_space<vmem>>, vector<32x16xbf16>
    tpu.vector_store %arg3[%c0_3, %c0_4], %3 {strides = array<i32>} : memref<32x16xbf16, #tpu.memory_space<vmem>>, vector<32x16xbf16>,
    %cst_5 = arith.constant dense<0.000000e+00> : vector<16xf32>
    %5 = vector.multi_reduction <add>, %2, %cst_5 [0] : vector<32x16xf32> to vector<16xf32>
    %6 = vector.shape_cast %5 : vector<16xf32> to vector<1x16xf32>
    %7 = arith.mulf %2, %2 : vector<32x16xf32>
    %cst_6 = arith.constant dense<0.000000e+00> : vector<16xf32>
    %8 = vector.multi_reduction <add>, %7, %cst_6 [0] : vector<32x16xf32> to vector<16xf32>
    %9 = vector.shape_cast %8 : vector<16xf32> to vector<1x16xf32>
    %10 = vector.shape_cast %6 : vector<1x16xf32> to vector<1x16xf32>
    %11 = vector.broadcast %10 : vector<1x16xf32> to vector<8x16xf32>
    %c0_7 = arith.constant 0 : index
    %c0_8 = arith.constant 0 : index
    %12 = vector.load %arg4[%c0_7, %c0_8] : memref<8x16xf32, #tpu.memory_space<vmem>>, vector<8x16xf32>
    tpu.vector_store %arg4[%c0_7, %c0_8], %11 {strides = array<i32>} : memref<8x16xf32, #tpu.memory_space<vmem>>, vector<8x16xf32>,
    %13 = vector.shape_cast %9 : vector<1x16xf32> to vector<1x16xf32>
    %14 = vector.broadcast %13 : vector<1x16xf32> to vector<8x16xf32>
    %c0_9 = arith.constant 0 : index
    %c0_10 = arith.constant 0 : index
    %15 = vector.load %arg5[%c0_9, %c0_10] : memref<8x16xf32, #tpu.memory_space<vmem>>, vector<8x16xf32>
    tpu.vector_store %arg5[%c0_9, %c0_10], %14 {strides = array<i32>} : memref<8x16xf32, #tpu.memory_space<vmem>>, vector<8x16xf32>,
    return
  }
  func.func @transform_0(%arg0: i32) -> (i32, i32) {
    %c0_i32 = arith.constant 0 : i32
    %c0_i32_0 = arith.constant 0 : i32
    return %arg0, %c0_i32 : i32, i32
  }
  func.func @transform_1(%arg0: i32) -> (i32, i32) {
    %c0_i32 = arith.constant 0 : i32
    %c0_i32_0 = arith.constant 0 : i32
    %c0_i32_1 = arith.constant 0 : i32
    return %c0_i32, %c0_i32_0 : i32, i32
  }
  func.func @transform_2(%arg0: i32) -> (i32, i32) {
    %c0_i32 = arith.constant 0 : i32
    %c0_i32_0 = arith.constant 0 : i32
    return %arg0, %c0_i32 : i32, i32
  }
  func.func @transform_3(%arg0: i32) -> (i32, i32) {
    %c0_i32 = arith.constant 0 : i32
    %c0_i32_0 = arith.constant 0 : i32
    return %arg0, %c0_i32 : i32, i32
  }
  func.func @transform_4(%arg0: i32) -> (i32, i32) {
    %c0_i32 = arith.constant 0 : i32
    %c0_i32_0 = arith.constant 0 : i32
    return %arg0, %c0_i32 : i32, i32
  }
}

module attributes {stable_mosaic.version = 11 : i64} {
  func.func @_scale_bias_act_kernel(%arg0: i32, %arg1: memref<32x16xbf16, #tpu.memory_space<vmem>>, %arg2: memref<1x16xf32, #tpu.memory_space<vmem>>, %arg3: memref<1x16xf32, #tpu.memory_space<vmem>>, %arg4: memref<32x16xbf16, #tpu.memory_space<vmem>>) attributes {dimension_semantics = [#tpu.dimension_semantics<parallel>], iteration_bounds = array<i64: 1>, scalar_prefetch = 0 : i64, scratch_operands = 0 : i64, tpu.core_type = #tpu.core_type<tc>, window_params = [{transform_indices = @transform_0, window_bounds = array<i64: 32, 16>}, {pipeline_mode = #tpu.pipeline_mode<synchronous>, transform_indices = @transform_1, window_bounds = array<i64: 1, 16>}, {pipeline_mode = #tpu.pipeline_mode<synchronous>, transform_indices = @transform_2, window_bounds = array<i64: 1, 16>}, {transform_indices = @transform_3, window_bounds = array<i64: 32, 16>}]} {
    %c0 = arith.constant 0 : index
    %c0_0 = arith.constant 0 : index
    %0 = vector.load %arg1[%c0, %c0_0] : memref<32x16xbf16, #tpu.memory_space<vmem>>, vector<32x16xbf16>
    %1 = arith.extf %0 : vector<32x16xbf16> to vector<32x16xf32>
    %c0_1 = arith.constant 0 : index
    %c0_2 = arith.constant 0 : index
    %2 = vector.load %arg2[%c0_1, %c0_2] : memref<1x16xf32, #tpu.memory_space<vmem>>, vector<1x16xf32>
    %3 = vector.broadcast %2 : vector<1x16xf32> to vector<32x16xf32>
    %4 = arith.mulf %1, %3 : vector<32x16xf32>
    %c0_3 = arith.constant 0 : index
    %c0_4 = arith.constant 0 : index
    %5 = vector.load %arg3[%c0_3, %c0_4] : memref<1x16xf32, #tpu.memory_space<vmem>>, vector<1x16xf32>
    %6 = vector.broadcast %5 : vector<1x16xf32> to vector<32x16xf32>
    %7 = arith.addf %4, %6 : vector<32x16xf32>
    %cst = arith.constant 0.000000e+00 : f32
    %8 = vector.broadcast %cst : f32 to vector<32x16xf32>
    %9 = arith.cmpf oge, %7, %8 : vector<32x16xf32>
    %cst_5 = arith.constant 2.000000e-01 : f32
    %10 = vector.broadcast %cst_5 : f32 to vector<32x16xf32>
    %11 = arith.mulf %10, %7 : vector<32x16xf32>
    %12 = arith.select %9, %7, %11 : vector<32x16xi1>, vector<32x16xf32>
    %13 = arith.truncf %12 : vector<32x16xf32> to vector<32x16xbf16>
    %c0_6 = arith.constant 0 : index
    %c0_7 = arith.constant 0 : index
    %14 = vector.load %arg4[%c0_6, %c0_7] : memref<32x16xbf16, #tpu.memory_space<vmem>>, vector<32x16xbf16>
    tpu.vector_store %arg4[%c0_6, %c0_7], %13 {strides = array<i32>} : memref<32x16xbf16, #tpu.memory_space<vmem>>, vector<32x16xbf16>,
    return
  }
  func.func @transform_0(%arg0: i32) -> (i32, i32) {
    %c0_i32 = arith.constant 0 : i32
    %c0_i32_0 = arith.constant 0 : i32
    return %arg0, %c0_i32 : i32, i32
  }
  func.func @transform_1(%arg0: i32) -> (i32, i32) {
    %c0_i32 = arith.constant 0 : i32
    %c0_i32_0 = arith.constant 0 : i32
    %c0_i32_1 = arith.constant 0 : i32
    return %c0_i32, %c0_i32_0 : i32, i32
  }
  func.func @transform_2(%arg0: i32) -> (i32, i32) {
    %c0_i32 = arith.constant 0 : i32
    %c0_i32_0 = arith.constant 0 : i32
    %c0_i32_1 = arith.constant 0 : i32
    return %c0_i32, %c0_i32_0 : i32, i32
  }
  func.func @transform_3(%arg0: i32) -> (i32, i32) {
    %c0_i32 = arith.constant 0 : i32
    %c0_i32_0 = arith.constant 0 : i32
    return %arg0, %c0_i32 : i32, i32
  }
}

module attributes {stable_mosaic.version = 11 : i64} {
  func.func @_matmul_stats_kernel(%arg0: i32, %arg1: memref<32x144xbf16, #tpu.memory_space<vmem>>, %arg2: memref<144x64xbf16, #tpu.memory_space<vmem>>, %arg3: memref<32x64xbf16, #tpu.memory_space<vmem>>, %arg4: memref<8x64xf32, #tpu.memory_space<vmem>>, %arg5: memref<8x64xf32, #tpu.memory_space<vmem>>) attributes {dimension_semantics = [#tpu.dimension_semantics<parallel>], iteration_bounds = array<i64: 1>, scalar_prefetch = 0 : i64, scratch_operands = 0 : i64, tpu.core_type = #tpu.core_type<tc>, window_params = [{transform_indices = @transform_0, window_bounds = array<i64: 32, 144>}, {pipeline_mode = #tpu.pipeline_mode<synchronous>, transform_indices = @transform_1, window_bounds = array<i64: 144, 64>}, {transform_indices = @transform_2, window_bounds = array<i64: 32, 64>}, {transform_indices = @transform_3, window_bounds = array<i64: 8, 64>}, {transform_indices = @transform_4, window_bounds = array<i64: 8, 64>}]} {
    %c0 = arith.constant 0 : index
    %c0_0 = arith.constant 0 : index
    %0 = vector.load %arg1[%c0, %c0_0] : memref<32x144xbf16, #tpu.memory_space<vmem>>, vector<32x144xbf16>
    %c0_1 = arith.constant 0 : index
    %c0_2 = arith.constant 0 : index
    %1 = vector.load %arg2[%c0_1, %c0_2] : memref<144x64xbf16, #tpu.memory_space<vmem>>, vector<144x64xbf16>
    %cst = arith.constant dense<0.000000e+00> : vector<32x64xf32>
    %2 = tpu.matmul %0, %1, %cst {dimension_numbers = #tpu.dot_dimension_numbers<[1], [0], [0], [1], [0, 0, 1, 1], [], []>} : vector<32x144xbf16>, vector<144x64xbf16>, vector<32x64xf32> -> vector<32x64xf32>
    %3 = arith.truncf %2 : vector<32x64xf32> to vector<32x64xbf16>
    %c0_3 = arith.constant 0 : index
    %c0_4 = arith.constant 0 : index
    %4 = vector.load %arg3[%c0_3, %c0_4] : memref<32x64xbf16, #tpu.memory_space<vmem>>, vector<32x64xbf16>
    tpu.vector_store %arg3[%c0_3, %c0_4], %3 {strides = array<i32>} : memref<32x64xbf16, #tpu.memory_space<vmem>>, vector<32x64xbf16>,
    %cst_5 = arith.constant dense<0.000000e+00> : vector<64xf32>
    %5 = vector.multi_reduction <add>, %2, %cst_5 [0] : vector<32x64xf32> to vector<64xf32>
    %6 = vector.shape_cast %5 : vector<64xf32> to vector<1x64xf32>
    %7 = arith.mulf %2, %2 : vector<32x64xf32>
    %cst_6 = arith.constant dense<0.000000e+00> : vector<64xf32>
    %8 = vector.multi_reduction <add>, %7, %cst_6 [0] : vector<32x64xf32> to vector<64xf32>
    %9 = vector.shape_cast %8 : vector<64xf32> to vector<1x64xf32>
    %10 = vector.shape_cast %6 : vector<1x64xf32> to vector<1x64xf32>
    %11 = vector.broadcast %10 : vector<1x64xf32> to vector<8x64xf32>
    %c0_7 = arith.constant 0 : index
    %c0_8 = arith.constant 0 : index
    %12 = vector.load %arg4[%c0_7, %c0_8] : memref<8x64xf32, #tpu.memory_space<vmem>>, vector<8x64xf32>
    tpu.vector_store %arg4[%c0_7, %c0_8], %11 {strides = array<i32>} : memref<8x64xf32, #tpu.memory_space<vmem>>, vector<8x64xf32>,
    %13 = vector.shape_cast %9 : vector<1x64xf32> to vector<1x64xf32>
    %14 = vector.broadcast %13 : vector<1x64xf32> to vector<8x64xf32>
    %c0_9 = arith.constant 0 : index
    %c0_10 = arith.constant 0 : index
    %15 = vector.load %arg5[%c0_9, %c0_10] : memref<8x64xf32, #tpu.memory_space<vmem>>, vector<8x64xf32>
    tpu.vector_store %arg5[%c0_9, %c0_10], %14 {strides = array<i32>} : memref<8x64xf32, #tpu.memory_space<vmem>>, vector<8x64xf32>,
    return
  }
  func.func @transform_0(%arg0: i32) -> (i32, i32) {
    %c0_i32 = arith.constant 0 : i32
    %c0_i32_0 = arith.constant 0 : i32
    return %arg0, %c0_i32 : i32, i32
  }
  func.func @transform_1(%arg0: i32) -> (i32, i32) {
    %c0_i32 = arith.constant 0 : i32
    %c0_i32_0 = arith.constant 0 : i32
    %c0_i32_1 = arith.constant 0 : i32
    return %c0_i32, %c0_i32_0 : i32, i32
  }
  func.func @transform_2(%arg0: i32) -> (i32, i32) {
    %c0_i32 = arith.constant 0 : i32
    %c0_i32_0 = arith.constant 0 : i32
    return %arg0, %c0_i32 : i32, i32
  }
  func.func @transform_3(%arg0: i32) -> (i32, i32) {
    %c0_i32 = arith.constant 0 : i32
    %c0_i32_0 = arith.constant 0 : i32
    return %arg0, %c0_i32 : i32, i32
  }
  func.func @transform_4(%arg0: i32) -> (i32, i32) {
    %c0_i32 = arith.constant 0 : i32
    %c0_i32_0 = arith.constant 0 : i32
    return %arg0, %c0_i32 : i32, i32
  }
}

module attributes {stable_mosaic.version = 11 : i64} {
  func.func @_scale_bias_act_kernel(%arg0: i32, %arg1: memref<32x64xbf16, #tpu.memory_space<vmem>>, %arg2: memref<1x64xf32, #tpu.memory_space<vmem>>, %arg3: memref<1x64xf32, #tpu.memory_space<vmem>>, %arg4: memref<32x64xbf16, #tpu.memory_space<vmem>>) attributes {dimension_semantics = [#tpu.dimension_semantics<parallel>], iteration_bounds = array<i64: 1>, scalar_prefetch = 0 : i64, scratch_operands = 0 : i64, tpu.core_type = #tpu.core_type<tc>, window_params = [{transform_indices = @transform_0, window_bounds = array<i64: 32, 64>}, {pipeline_mode = #tpu.pipeline_mode<synchronous>, transform_indices = @transform_1, window_bounds = array<i64: 1, 64>}, {pipeline_mode = #tpu.pipeline_mode<synchronous>, transform_indices = @transform_2, window_bounds = array<i64: 1, 64>}, {transform_indices = @transform_3, window_bounds = array<i64: 32, 64>}]} {
    %c0 = arith.constant 0 : index
    %c0_0 = arith.constant 0 : index
    %0 = vector.load %arg1[%c0, %c0_0] : memref<32x64xbf16, #tpu.memory_space<vmem>>, vector<32x64xbf16>
    %1 = arith.extf %0 : vector<32x64xbf16> to vector<32x64xf32>
    %c0_1 = arith.constant 0 : index
    %c0_2 = arith.constant 0 : index
    %2 = vector.load %arg2[%c0_1, %c0_2] : memref<1x64xf32, #tpu.memory_space<vmem>>, vector<1x64xf32>
    %3 = vector.broadcast %2 : vector<1x64xf32> to vector<32x64xf32>
    %4 = arith.mulf %1, %3 : vector<32x64xf32>
    %c0_3 = arith.constant 0 : index
    %c0_4 = arith.constant 0 : index
    %5 = vector.load %arg3[%c0_3, %c0_4] : memref<1x64xf32, #tpu.memory_space<vmem>>, vector<1x64xf32>
    %6 = vector.broadcast %5 : vector<1x64xf32> to vector<32x64xf32>
    %7 = arith.addf %4, %6 : vector<32x64xf32>
    %cst = arith.constant 0.000000e+00 : f32
    %8 = vector.broadcast %cst : f32 to vector<32x64xf32>
    %9 = arith.maximumf %7, %8 : vector<32x64xf32>
    %10 = arith.truncf %9 : vector<32x64xf32> to vector<32x64xbf16>
    %c0_5 = arith.constant 0 : index
    %c0_6 = arith.constant 0 : index
    %11 = vector.load %arg4[%c0_5, %c0_6] : memref<32x64xbf16, #tpu.memory_space<vmem>>, vector<32x64xbf16>
    tpu.vector_store %arg4[%c0_5, %c0_6], %10 {strides = array<i32>} : memref<32x64xbf16, #tpu.memory_space<vmem>>, vector<32x64xbf16>,
    return
  }
  func.func @transform_0(%arg0: i32) -> (i32, i32) {
    %c0_i32 = arith.constant 0 : i32
    %c0_i32_0 = arith.constant 0 : i32
    return %arg0, %c0_i32 : i32, i32
  }
  func.func @transform_1(%arg0: i32) -> (i32, i32) {
    %c0_i32 = arith.constant 0 : i32
    %c0_i32_0 = arith.constant 0 : i32
    %c0_i32_1 = arith.constant 0 : i32
    return %c0_i32, %c0_i32_0 : i32, i32
  }
  func.func @transform_2(%arg0: i32) -> (i32, i32) {
    %c0_i32 = arith.constant 0 : i32
    %c0_i32_0 = arith.constant 0 : i32
    %c0_i32_1 = arith.constant 0 : i32
    return %c0_i32, %c0_i32_0 : i32, i32
  }
  func.func @transform_3(%arg0: i32) -> (i32, i32) {
    %c0_i32 = arith.constant 0 : i32
    %c0_i32_0 = arith.constant 0 : i32
    return %arg0, %c0_i32 : i32, i32
  }
}

module attributes {stable_mosaic.version = 11 : i64} {
  func.func @_matmul_stats_kernel(%arg0: i32, %arg1: memref<128x144xbf16, #tpu.memory_space<vmem>>, %arg2: memref<144x32xbf16, #tpu.memory_space<vmem>>, %arg3: memref<128x32xbf16, #tpu.memory_space<vmem>>, %arg4: memref<8x32xf32, #tpu.memory_space<vmem>>, %arg5: memref<8x32xf32, #tpu.memory_space<vmem>>) attributes {dimension_semantics = [#tpu.dimension_semantics<parallel>], iteration_bounds = array<i64: 1>, scalar_prefetch = 0 : i64, scratch_operands = 0 : i64, tpu.core_type = #tpu.core_type<tc>, window_params = [{transform_indices = @transform_0, window_bounds = array<i64: 128, 144>}, {pipeline_mode = #tpu.pipeline_mode<synchronous>, transform_indices = @transform_1, window_bounds = array<i64: 144, 32>}, {transform_indices = @transform_2, window_bounds = array<i64: 128, 32>}, {transform_indices = @transform_3, window_bounds = array<i64: 8, 32>}, {transform_indices = @transform_4, window_bounds = array<i64: 8, 32>}]} {
    %c0 = arith.constant 0 : index
    %c0_0 = arith.constant 0 : index
    %0 = vector.load %arg1[%c0, %c0_0] : memref<128x144xbf16, #tpu.memory_space<vmem>>, vector<128x144xbf16>
    %c0_1 = arith.constant 0 : index
    %c0_2 = arith.constant 0 : index
    %1 = vector.load %arg2[%c0_1, %c0_2] : memref<144x32xbf16, #tpu.memory_space<vmem>>, vector<144x32xbf16>
    %cst = arith.constant dense<0.000000e+00> : vector<128x32xf32>
    %2 = tpu.matmul %0, %1, %cst {dimension_numbers = #tpu.dot_dimension_numbers<[1], [0], [0], [1], [0, 0, 1, 1], [], []>} : vector<128x144xbf16>, vector<144x32xbf16>, vector<128x32xf32> -> vector<128x32xf32>
    %3 = arith.truncf %2 : vector<128x32xf32> to vector<128x32xbf16>
    %c0_3 = arith.constant 0 : index
    %c0_4 = arith.constant 0 : index
    %4 = vector.load %arg3[%c0_3, %c0_4] : memref<128x32xbf16, #tpu.memory_space<vmem>>, vector<128x32xbf16>
    tpu.vector_store %arg3[%c0_3, %c0_4], %3 {strides = array<i32>} : memref<128x32xbf16, #tpu.memory_space<vmem>>, vector<128x32xbf16>,
    %cst_5 = arith.constant dense<0.000000e+00> : vector<32xf32>
    %5 = vector.multi_reduction <add>, %2, %cst_5 [0] : vector<128x32xf32> to vector<32xf32>
    %6 = vector.shape_cast %5 : vector<32xf32> to vector<1x32xf32>
    %7 = arith.mulf %2, %2 : vector<128x32xf32>
    %cst_6 = arith.constant dense<0.000000e+00> : vector<32xf32>
    %8 = vector.multi_reduction <add>, %7, %cst_6 [0] : vector<128x32xf32> to vector<32xf32>
    %9 = vector.shape_cast %8 : vector<32xf32> to vector<1x32xf32>
    %10 = vector.shape_cast %6 : vector<1x32xf32> to vector<1x32xf32>
    %11 = vector.broadcast %10 : vector<1x32xf32> to vector<8x32xf32>
    %c0_7 = arith.constant 0 : index
    %c0_8 = arith.constant 0 : index
    %12 = vector.load %arg4[%c0_7, %c0_8] : memref<8x32xf32, #tpu.memory_space<vmem>>, vector<8x32xf32>
    tpu.vector_store %arg4[%c0_7, %c0_8], %11 {strides = array<i32>} : memref<8x32xf32, #tpu.memory_space<vmem>>, vector<8x32xf32>,
    %13 = vector.shape_cast %9 : vector<1x32xf32> to vector<1x32xf32>
    %14 = vector.broadcast %13 : vector<1x32xf32> to vector<8x32xf32>
    %c0_9 = arith.constant 0 : index
    %c0_10 = arith.constant 0 : index
    %15 = vector.load %arg5[%c0_9, %c0_10] : memref<8x32xf32, #tpu.memory_space<vmem>>, vector<8x32xf32>
    tpu.vector_store %arg5[%c0_9, %c0_10], %14 {strides = array<i32>} : memref<8x32xf32, #tpu.memory_space<vmem>>, vector<8x32xf32>,
    return
  }
  func.func @transform_0(%arg0: i32) -> (i32, i32) {
    %c0_i32 = arith.constant 0 : i32
    %c0_i32_0 = arith.constant 0 : i32
    return %arg0, %c0_i32 : i32, i32
  }
  func.func @transform_1(%arg0: i32) -> (i32, i32) {
    %c0_i32 = arith.constant 0 : i32
    %c0_i32_0 = arith.constant 0 : i32
    %c0_i32_1 = arith.constant 0 : i32
    return %c0_i32, %c0_i32_0 : i32, i32
  }
  func.func @transform_2(%arg0: i32) -> (i32, i32) {
    %c0_i32 = arith.constant 0 : i32
    %c0_i32_0 = arith.constant 0 : i32
    return %arg0, %c0_i32 : i32, i32
  }
  func.func @transform_3(%arg0: i32) -> (i32, i32) {
    %c0_i32 = arith.constant 0 : i32
    %c0_i32_0 = arith.constant 0 : i32
    return %arg0, %c0_i32 : i32, i32
  }
  func.func @transform_4(%arg0: i32) -> (i32, i32) {
    %c0_i32 = arith.constant 0 : i32
    %c0_i32_0 = arith.constant 0 : i32
    return %arg0, %c0_i32 : i32, i32
  }
}

module attributes {stable_mosaic.version = 11 : i64} {
  func.func @_scale_bias_act_kernel(%arg0: i32, %arg1: memref<128x32xbf16, #tpu.memory_space<vmem>>, %arg2: memref<1x32xf32, #tpu.memory_space<vmem>>, %arg3: memref<1x32xf32, #tpu.memory_space<vmem>>, %arg4: memref<128x32xbf16, #tpu.memory_space<vmem>>) attributes {dimension_semantics = [#tpu.dimension_semantics<parallel>], iteration_bounds = array<i64: 1>, scalar_prefetch = 0 : i64, scratch_operands = 0 : i64, tpu.core_type = #tpu.core_type<tc>, window_params = [{transform_indices = @transform_0, window_bounds = array<i64: 128, 32>}, {pipeline_mode = #tpu.pipeline_mode<synchronous>, transform_indices = @transform_1, window_bounds = array<i64: 1, 32>}, {pipeline_mode = #tpu.pipeline_mode<synchronous>, transform_indices = @transform_2, window_bounds = array<i64: 1, 32>}, {transform_indices = @transform_3, window_bounds = array<i64: 128, 32>}]} {
    %c0 = arith.constant 0 : index
    %c0_0 = arith.constant 0 : index
    %0 = vector.load %arg1[%c0, %c0_0] : memref<128x32xbf16, #tpu.memory_space<vmem>>, vector<128x32xbf16>
    %1 = arith.extf %0 : vector<128x32xbf16> to vector<128x32xf32>
    %c0_1 = arith.constant 0 : index
    %c0_2 = arith.constant 0 : index
    %2 = vector.load %arg2[%c0_1, %c0_2] : memref<1x32xf32, #tpu.memory_space<vmem>>, vector<1x32xf32>
    %3 = vector.broadcast %2 : vector<1x32xf32> to vector<128x32xf32>
    %4 = arith.mulf %1, %3 : vector<128x32xf32>
    %c0_3 = arith.constant 0 : index
    %c0_4 = arith.constant 0 : index
    %5 = vector.load %arg3[%c0_3, %c0_4] : memref<1x32xf32, #tpu.memory_space<vmem>>, vector<1x32xf32>
    %6 = vector.broadcast %5 : vector<1x32xf32> to vector<128x32xf32>
    %7 = arith.addf %4, %6 : vector<128x32xf32>
    %cst = arith.constant 0.000000e+00 : f32
    %8 = vector.broadcast %cst : f32 to vector<128x32xf32>
    %9 = arith.maximumf %7, %8 : vector<128x32xf32>
    %10 = arith.truncf %9 : vector<128x32xf32> to vector<128x32xbf16>
    %c0_5 = arith.constant 0 : index
    %c0_6 = arith.constant 0 : index
    %11 = vector.load %arg4[%c0_5, %c0_6] : memref<128x32xbf16, #tpu.memory_space<vmem>>, vector<128x32xbf16>
    tpu.vector_store %arg4[%c0_5, %c0_6], %10 {strides = array<i32>} : memref<128x32xbf16, #tpu.memory_space<vmem>>, vector<128x32xbf16>,
    return
  }
  func.func @transform_0(%arg0: i32) -> (i32, i32) {
    %c0_i32 = arith.constant 0 : i32
    %c0_i32_0 = arith.constant 0 : i32
    return %arg0, %c0_i32 : i32, i32
  }
  func.func @transform_1(%arg0: i32) -> (i32, i32) {
    %c0_i32 = arith.constant 0 : i32
    %c0_i32_0 = arith.constant 0 : i32
    %c0_i32_1 = arith.constant 0 : i32
    return %c0_i32, %c0_i32_0 : i32, i32
  }
  func.func @transform_2(%arg0: i32) -> (i32, i32) {
    %c0_i32 = arith.constant 0 : i32
    %c0_i32_0 = arith.constant 0 : i32
    %c0_i32_1 = arith.constant 0 : i32
    return %c0_i32, %c0_i32_0 : i32, i32
  }
  func.func @transform_3(%arg0: i32) -> (i32, i32) {
    %c0_i32 = arith.constant 0 : i32
    %c0_i32_0 = arith.constant 0 : i32
    return %arg0, %c0_i32 : i32, i32
  }
}

module attributes {stable_mosaic.version = 11 : i64} {
  func.func @_matmul_act_kernel(%arg0: i32, %arg1: memref<512x72xbf16, #tpu.memory_space<vmem>>, %arg2: memref<72x12xbf16, #tpu.memory_space<vmem>>, %arg3: memref<512x12xf32, #tpu.memory_space<vmem>>) attributes {dimension_semantics = [#tpu.dimension_semantics<parallel>], iteration_bounds = array<i64: 1>, scalar_prefetch = 0 : i64, scratch_operands = 0 : i64, tpu.core_type = #tpu.core_type<tc>, window_params = [{transform_indices = @transform_0, window_bounds = array<i64: 512, 72>}, {pipeline_mode = #tpu.pipeline_mode<synchronous>, transform_indices = @transform_1, window_bounds = array<i64: 72, 12>}, {transform_indices = @transform_2, window_bounds = array<i64: 512, 12>}]} {
    %c0 = arith.constant 0 : index
    %c0_0 = arith.constant 0 : index
    %0 = vector.load %arg1[%c0, %c0_0] : memref<512x72xbf16, #tpu.memory_space<vmem>>, vector<512x72xbf16>
    %c0_1 = arith.constant 0 : index
    %c0_2 = arith.constant 0 : index
    %1 = vector.load %arg2[%c0_1, %c0_2] : memref<72x12xbf16, #tpu.memory_space<vmem>>, vector<72x12xbf16>
    %cst = arith.constant dense<0.000000e+00> : vector<512x12xf32>
    %2 = tpu.matmul %0, %1, %cst {dimension_numbers = #tpu.dot_dimension_numbers<[1], [0], [0], [1], [0, 0, 1, 1], [], []>} : vector<512x72xbf16>, vector<72x12xbf16>, vector<512x12xf32> -> vector<512x12xf32>
    %3 = arith.negf %2 : vector<512x12xf32>
    %4 = math.exp %3 : vector<512x12xf32>
    %cst_3 = arith.constant 1.000000e+00 : f32
    %5 = vector.broadcast %cst_3 : f32 to vector<512x12xf32>
    %6 = arith.addf %5, %4 : vector<512x12xf32>
    %7 = arith.divf %5, %6 : vector<512x12xf32>
    %c0_4 = arith.constant 0 : index
    %c0_5 = arith.constant 0 : index
    %8 = vector.load %arg3[%c0_4, %c0_5] : memref<512x12xf32, #tpu.memory_space<vmem>>, vector<512x12xf32>
    tpu.vector_store %arg3[%c0_4, %c0_5], %7 {strides = array<i32>} : memref<512x12xf32, #tpu.memory_space<vmem>>, vector<512x12xf32>,
    return
  }
  func.func @transform_0(%arg0: i32) -> (i32, i32) {
    %c0_i32 = arith.constant 0 : i32
    %c0_i32_0 = arith.constant 0 : i32
    return %arg0, %c0_i32 : i32, i32
  }
  func.func @transform_1(%arg0: i32) -> (i32, i32) {
    %c0_i32 = arith.constant 0 : i32
    %c0_i32_0 = arith.constant 0 : i32
    %c0_i32_1 = arith.constant 0 : i32
    return %c0_i32, %c0_i32_0 : i32, i32
  }
  func.func @transform_2(%arg0: i32) -> (i32, i32) {
    %c0_i32 = arith.constant 0 : i32
    %c0_i32_0 = arith.constant 0 : i32
    return %arg0, %c0_i32 : i32, i32
  }
}

</mosaic_0001>

<bundles_post_ra>
// kernel: _generator_forward.8
= control target key start
LH: loop header
LB: loop body
LE: loop exit
PB: predicated region body
PF: predicated region fallthrough
CT: control target
= control target key end

     0   :  { %vm100_vm0 = vcmask 523264   ;;  %vm334_vm3 = vcmask 60416   ;;  %s586_s1 = inlined_call_operand.vmem [shape: bf16[64,8], index: 1, kind: input, shape index: {}]   ;;  %s587_s0 = inlined_call_operand.vmem [shape: bf16[128,64], index: 0, kind: input, shape index: {}]   ;;  %s588_s2 = inlined_call_operand.vmem [shape: bf16[128,8], index: 2, kind: output, shape index: {}]  }
   0x1   :  { %v451_v0 = vld [vmem:[%s586_s1 + $0x18] sm:$0xff]   ;;  %v452_v1 = vld [vmem:[%s586_s1 + $0x10] sm:$0xff]   ;;  %v453_v2 = vld [vmem:[%s586_s1 + $0x8] sm:$0xff]  }
   0x2   :  { %419 = vmatprep.subr.bf16.mxu0 %v451_v0  ;;  %443 = vmatprep.subr.bf16.mxu1 %v451_v0  ;;  %v455_v3 = vld [vmem:[%s587_s0] sm:$0xff]   ;;  %v457_v6 = vld [vmem:[%s587_s0 + $0x8] sm:$0xff]   ;;  %v459_v8 = vld [vmem:[%s587_s0 + $0x10] sm:$0xff]  }
   0x3   :  { %420 = vmatpush3.bf16.msra.mxu0 %v451_v0  ;;  %447 = vmatpush3.bf16.msra.mxu1 %v451_v0  ;;  %v456_v4 = vld [vmem:[%s587_s0 + $0x20] sm:$0xff]   ;;  %v458_v7 = vld [vmem:[%s587_s0 + $0x28] sm:$0xff]   ;;  %v460_v9 = vld [vmem:[%s587_s0 + $0x30] sm:$0xff]  }
   0x4   :  { %421 = vmatprep.subr.bf16.mxu0 %v452_v1  ;;  %444 = vmatprep.subr.bf16.mxu1 %v452_v1  ;;  %v454_v5 = vld [vmem:[%s586_s1] sm:$0xff]   ;;  %v461_v10 = vld [vmem:[%s587_s0 + $0x18] sm:$0xff]  }
   0x5   :  { %427 = vmatprep.mubr.msk.bf16.mxu0 %vm100_vm0, %v455_v3  ;;  %435 = vmatprep.mubr.msk.bf16.mxu1 %vm100_vm0, %v456_v4  ;;  %v462_v11 = vld [vmem:[%s587_s0 + $0x38] sm:$0xff]  }
   0x7   :  { %422 = vmatpush3.bf16.msra.mxu0 %v452_v1  ;;  %448 = vmatpush3.bf16.msra.mxu1 %v452_v1 }
   0x8   :  { %423 = vmatprep.subr.bf16.mxu0 %v453_v2  ;;  %445 = vmatprep.subr.bf16.mxu1 %v453_v2 }
   0xb   :  { %424 = vmatpush3.bf16.msra.mxu0 %v453_v2  ;;  %449 = vmatpush3.bf16.msra.mxu1 %v453_v2 }
   0xc   :  { %425 = vmatprep.subr.bf16.mxu0 %v454_v5  ;;  %446 = vmatprep.subr.bf16.mxu1 %v454_v5 }
   0xf   :  { %426 = vmatpush3.bf16.msra.mxu0 %v454_v5  ;;  %450 = vmatpush3.bf16.msra.mxu1 %v454_v5 }
  0x12   :  { %428 = vmatmul.mubr.msk.bf16.vlgmr.msra.gmra.mxu0 %vm100_vm0, %v457_v6  ;;  %436 = vmatmul.mubr.msk.bf16.vlgmr.msra.gmra.mxu1 %vm100_vm0, %v458_v7 }
  0x13   :  { %431 = vmatprep.mubr.msk.bf16.mxu0 %vm100_vm0, %v459_v8  ;;  %439 = vmatprep.mubr.msk.bf16.mxu1 %vm100_vm0, %v460_v9 }
  0x1a   :  { %432 = vmatmul.mubr.msk.bf16.gmra.mxu0 %vm100_vm0, %v461_v10  ;;  %440 = vmatmul.mubr.msk.bf16.gmra.mxu1 %vm100_vm0, %v462_v11 }
  0xd2   :  { %v429_v12 = vpop.f32.mrf.mxu0  ;;  %v437_v13 = vpop.f32.mrf.mxu1 }
  0xd3   :  { %vm224_vm1 = vcmp.ge.f32.partialorder %v429_v12, 0.0  ;;  %v240_v14 = vmul.f32 0.2, %v429_v12  ;;  %vm232_vm2 = vcmp.ge.f32.partialorder %v437_v13, 0.0  ;;  %v248_v15 = vmul.f32 0.2, %v437_v13 }
  0xd4   :  { %v159_v16 = vpop.f32.mrf.mxu0  ;;  %v191_v17 = vpop.f32.mrf.mxu1 }
  0xd5   :  { %v256_v18 = vsel %vm224_vm1, %v429_v12, %v240_v14  ;;  %v264_v19 = vsel %vm232_vm2, %v437_v13, %v248_v15  ;;  %vm222_vm4 = vcmp.ge.f32.partialorder %v159_v16, 0.0  ;;  %v238_v20 = vmul.f32 0.2, %v159_v16 }
  0xd6   :  { %v393_v21 = vpack.c.bf16 %v256_v18, %v256_v18  ;;  %v401_v22 = vpack.c.bf16 %v264_v19, %v264_v19  ;;  %vm230_vm5 = vcmp.ge.f32.partialorder %v191_v17, 0.0  ;;  %v246_v23 = vmul.f32 0.2, %v191_v17  ;;  %v430_v24 = vpop.f32.mrf.mxu0  ;;  %v438_v25 = vpop.f32.mrf.mxu1 }
  0xd7   :  { %v254_v26 = vsel %vm222_vm4, %v159_v16, %v238_v20  ;;  %vm225_vm6 = vcmp.ge.f32.partialorder %v430_v24, 0.0  ;;  %v241_v27 = vmul.f32 0.2, %v430_v24  ;;  %vm233_vm7 = vcmp.ge.f32.partialorder %v438_v25, 0.0 }
  0xd8   :  { %337 = vst.msk [vmem:[%s588_s2 + $0x8] sm:$0xf] %vm334_vm3, %v393_v21  ;;  %345 = vst.msk [vmem:[%s588_s2 + $0x28] sm:$0xf] %vm334_vm3, %v401_v22  ;;  %v391_v28 = vpack.c.bf16 %v254_v26, %v254_v26  ;;  %v262_v29 = vsel %vm230_vm5, %v191_v17, %v246_v23  ;;  %v249_v30 = vmul.f32 0.2, %v438_v25  ;;  %v162_v31 = vpop.f32.mrf.mxu0  ;;  %v194_v32 = vpop.f32.mrf.mxu1 }
  0xd9   :  { %v399_v33 = vpack.c.bf16 %v262_v29, %v262_v29  ;;  %v257_v34 = vsel %vm225_vm6, %v430_v24, %v241_v27  ;;  %vm223_vm8 = vcmp.ge.f32.partialorder %v162_v31, 0.0  ;;  %v239_v35 = vmul.f32 0.2, %v162_v31 }
  0xda   :  { %335 = vst.msk [vmem:[%s588_s2] sm:$0xf] %vm334_vm3, %v391_v28  ;;  %v394_v36 = vpack.c.bf16 %v257_v34, %v257_v34  ;;  %v265_v37 = vsel %vm233_vm7, %v438_v25, %v249_v30  ;;  %vm231_vm9 = vcmp.ge.f32.partialorder %v194_v32, 0.0  ;;  %v247_v38 = vmul.f32 0.2, %v194_v32  ;;  %v433_v39 = vpop.f32.mrf.mxu0  ;;  %v441_v40 = vpop.f32.mrf.mxu1 }
  0xdb   :  { %343 = vst.msk [vmem:[%s588_s2 + $0x20] sm:$0xf] %vm334_vm3, %v399_v33  ;;  %v402_v41 = vpack.c.bf16 %v265_v37, %v265_v37  ;;  %v255_v42 = vsel %vm223_vm8, %v162_v31, %v239_v35  ;;  %vm228_vm10 = vcmp.ge.f32.partialorder %v433_v39, 0.0  ;;  %v244_v43 = vmul.f32 0.2, %v433_v39 }
  0xdc   :  { %338 = vst.msk [vmem:[%s588_s2 + $0xc] sm:$0xf] %vm334_vm3, %v394_v36  ;;  %v392_v44 = vpack.c.bf16 %v255_v42, %v255_v42  ;;  %v263_v45 = vsel %vm231_vm9, %v194_v32, %v247_v38  ;;  %vm236_vm11 = vcmp.ge.f32.partialorder %v441_v40, 0.0  ;;  %v252_v46 = vmul.f32 0.2, %v441_v40  ;;  %v175_v47 = vpop.f32.mrf.mxu0  ;;  %v207_v48 = vpop.f32.mrf.mxu1 }
  0xdd   :  { %346 = vst.msk [vmem:[%s588_s2 + $0x2c] sm:$0xf] %vm334_vm3, %v402_v41  ;;  %v400_v49 = vpack.c.bf16 %v263_v45, %v263_v45  ;;  %v260_v50 = vsel %vm228_vm10, %v433_v39, %v244_v43  ;;  %vm226_vm12 = vcmp.ge.f32.partialorder %v175_v47, 0.0  ;;  %v242_v51 = vmul.f32 0.2, %v175_v47 }
  0xde   :  { %336 = vst.msk [vmem:[%s588_s2 + $0x4] sm:$0xf] %vm334_vm3, %v392_v44  ;;  %v397_v52 = vpack.c.bf16 %v260_v50, %v260_v50  ;;  %v268_v53 = vsel %vm236_vm11, %v441_v40, %v252_v46  ;;  %vm234_vm13 = vcmp.ge.f32.partialorder %v207_v48, 0.0  ;;  %v250_v54 = vmul.f32 0.2, %v207_v48  ;;  %v434_v55 = vpop.f32.mrf.mxu0  ;;  %v442_v56 = vpop.f32.mrf.mxu1 }
  0xdf   :  { %344 = vst.msk [vmem:[%s588_s2 + $0x24] sm:$0xf] %vm334_vm3, %v400_v49  ;;  %v405_v57 = vpack.c.bf16 %v268_v53, %v268_v53  ;;  %v258_v58 = vsel %vm226_vm12, %v175_v47, %v242_v51  ;;  %vm229_vm14 = vcmp.ge.f32.partialorder %v434_v55, 0.0  ;;  %v245_v59 = vmul.f32 0.2, %v434_v55 }
  0xe0   :  { %341 = vst.msk [vmem:[%s588_s2 + $0x18] sm:$0xf] %vm334_vm3, %v397_v52  ;;  %v395_v60 = vpack.c.bf16 %v258_v58, %v258_v58  ;;  %v266_v61 = vsel %vm234_vm13, %v207_v48, %v250_v54  ;;  %vm237_vm15 = vcmp.ge.f32.partialorder %v442_v56, 0.0  ;;  %v253_v62 = vmul.f32 0.2, %v442_v56  ;;  %v178_v63 = vpop.f32.mrf.mxu0  ;;  %v210_v0 = vpop.f32.mrf.mxu1 }
  0xe1   :  { %349 = vst.msk [vmem:[%s588_s2 + $0x38] sm:$0xf] %vm334_vm3, %v405_v57  ;;  %v403_v1 = vpack.c.bf16 %v266_v61, %v266_v61  ;;  %v261_v2 = vsel %vm229_vm14, %v434_v55, %v245_v59  ;;  %vm227_vm0 = vcmp.ge.f32.partialorder %v178_v63, 0.0  ;;  %v243_v3 = vmul.f32 0.2, %v178_v63 }
  0xe2   :  { %339 = vst.msk [vmem:[%s588_s2 + $0x10] sm:$0xf] %vm334_vm3, %v395_v60  ;;  %v398_v4 = vpack.c.bf16 %v261_v2, %v261_v2  ;;  %v269_v5 = vsel %vm237_vm15, %v442_v56, %v253_v62  ;;  %vm235_vm1 = vcmp.ge.f32.partialorder %v210_v0, 0.0  ;;  %v251_v6 = vmul.f32 0.2, %v210_v0 }
  0xe3   :  { %347 = vst.msk [vmem:[%s588_s2 + $0x30] sm:$0xf] %vm334_vm3, %v403_v1  ;;  %v406_v7 = vpack.c.bf16 %v269_v5, %v269_v5  ;;  %v259_v8 = vsel %vm227_vm0, %v178_v63, %v243_v3 }
  0xe4   :  { %342 = vst.msk [vmem:[%s588_s2 + $0x1c] sm:$0xf] %vm334_vm3, %v398_v4  ;;  %v396_v9 = vpack.c.bf16 %v259_v8, %v259_v8  ;;  %v267_v10 = vsel %vm235_vm1, %v210_v0, %v251_v6 }
  0xe5   :  { %350 = vst.msk [vmem:[%s588_s2 + $0x3c] sm:$0xf] %vm334_vm3, %v406_v7  ;;  %v404_v11 = vpack.c.bf16 %v267_v10, %v267_v10 }
  0xe6   :  { %340 = vst.msk [vmem:[%s588_s2 + $0x14] sm:$0xf] %vm334_vm3, %v396_v9 }
  0xe7   :  { %348 = vst.msk [vmem:[%s588_s2 + $0x34] sm:$0xf] %vm334_vm3, %v404_v11 }

// kernel: _generator_forward.9
= control target key start
LH: loop header
LB: loop body
LE: loop exit
PB: predicated region body
PF: predicated region fallthrough
CT: control target
= control target key end

     0   :  { %vm160_vm0 = vcmask 125952   ;;  %vm165_vm1 = vcmask 130048   ;;  %s355_s1 = inlined_call_operand.vmem [shape: bf16[128,16], index: 1, kind: input, shape index: {}]   ;;  %s356_s0 = inlined_call_operand.vmem [shape: bf16[32,128], index: 0, kind: input, shape index: {}]   ;;  %s357_s2 = inlined_call_operand.vmem [shape: bf16[32,16], index: 2, kind: output, shape index: {0}]   ;;  %s358_s3 = inlined_call_operand.vmem [shape: f32[8,16], index: 3, kind: output, shape index: {1}]   ;;  %s359_s4 = inlined_call_operand.vmem [shape: f32[8,16], index: 4, kind: output, shape index: {2}]  }
   0x1   :  { %v258_v0 = vld [vmem:[%s355_s1 + $0x38] sm:$0xff]   ;;  %v259_v1 = vld [vmem:[%s355_s1 + $0x30] sm:$0xff]   ;;  %v260_v2 = vld [vmem:[%s355_s1 + $0x28] sm:$0xff]  }
   0x2   :  { %238 = vmatprep.subr.bf16.mxu0 %v258_v0  ;;  %v261_v3 = vld [vmem:[%s355_s1 + $0x20] sm:$0xff]   ;;  %v262_v5 = vld [vmem:[%s355_s1 + $0x18] sm:$0xff]   ;;  %v263_v6 = vld [vmem:[%s355_s1 + $0x10] sm:$0xff]  }
   0x3   :  { %239 = vmatpush3.bf16.msra.mxu0 %v258_v0  ;;  %v266_v4 = vld [vmem:[%s356_s0] sm:$0xff]   ;;  %v264_v7 = vld [vmem:[%s355_s1 + $0x8] sm:$0xff]  }
   0x4   :  { %240 = vmatprep.subr.bf16.mxu0 %v259_v1  ;;  %254 = vmatprep.mubr.bf16.mxu0 %v266_v4  ;;  %v265_v8 = vld [vmem:[%s355_s1] sm:$0xff]   ;;  %v267_v9 = vld [vmem:[%s356_s0 + $0x8] sm:$0xff]  }
   0x7   :  { %241 = vmatpush3.bf16.msra.mxu0 %v259_v1 }
   0x8   :  { %242 = vmatprep.subr.bf16.mxu0 %v260_v2 }
   0xb   :  { %243 = vmatpush3.bf16.msra.mxu0 %v260_v2 }
   0xc   :  { %244 = vmatprep.subr.bf16.mxu0 %v261_v3 }
   0xf   :  { %245 = vmatpush3.bf16.msra.mxu0 %v261_v3 }
  0x10   :  { %246 = vmatprep.subr.bf16.mxu0 %v262_v5 }
  0x13   :  { %247 = vmatpush3.bf16.msra.mxu0 %v262_v5 }
  0x14   :  { %248 = vmatprep.subr.bf16.mxu0 %v263_v6 }
  0x17   :  { %249 = vmatpush3.bf16.msra.mxu0 %v263_v6 }
  0x18   :  { %250 = vmatprep.subr.bf16.mxu0 %v264_v7 }
  0x1b   :  { %251 = vmatpush3.bf16.msra.mxu0 %v264_v7 }
  0x1c   :  { %252 = vmatprep.subr.bf16.mxu0 %v265_v8 }
  0x1f   :  { %253 = vmatpush3.bf16.msra.mxu0 %v265_v8 }
  0x22   :  { %255 = vmatmul.mubr.bf16.vlgmr.msra.gmra.mxu0 %v267_v9 }
  0xe2   :  { %v256_v10 = vpop.f32.mrf.mxu0 }
  0xe3   :  { %v226_v11 = vpack.c.bf16 %v256_v10, %v256_v10  ;;  %v181_v17 = vmul.f32 %v256_v10, %v256_v10  ;;  %v169_v24 = vsel %vm165_vm1, %v256_v10, 0.0 }
  0xe4   :  { %v129_v12 = vpop.f32.mrf.mxu0 }
  0xe5   :  { %163 = vst.msk [vmem:[%s357_s2 + $0x8] sm:$0xf] %vm160_vm0, %v226_v11  ;;  %v224_v13 = vpack.c.bf16 %v129_v12, %v129_v12  ;;  %v179_v15 = vmul.f32 %v129_v12, %v129_v12  ;;  %v166_v19 = vsel %vm165_vm1, %v129_v12, 0.0  ;;  %v186_v30 = vsel %vm165_vm1, %v181_v17, 0.0 }
  0xe6   :  { %v257_v14 = vpop.f32.mrf.mxu0 }
  0xe7   :  { %161 = vst.msk [vmem:[%s357_s2] sm:$0xf] %vm160_vm0, %v224_v13  ;;  %v227_v16 = vpack.c.bf16 %v257_v14, %v257_v14  ;;  %v183_v25 = vsel %vm165_vm1, %v179_v15, 0.0  ;;  %v182_v26 = vmul.f32 %v257_v14, %v257_v14  ;;  %v171_v31 = vsel %vm165_vm1, %v257_v14, 0.0 }
  0xe8   :  { %v132_v18 = vpop.f32.mrf.mxu0 }
  0xe9   :  { %164 = vst.msk [vmem:[%s357_s2 + $0xc] sm:$0xf] %vm160_vm0, %v227_v16  ;;  %v225_v20 = vpack.c.bf16 %v132_v18, %v132_v18  ;;  %v167_v21 = vsel %vm165_vm1, %v132_v18, 0.0  ;;  %v180_v22 = vmul.f32 %v132_v18, %v132_v18  ;;  %v188_v34 = vsel %vm165_vm1, %v182_v26, 0.0 }
  0xea   :  { %v168_v23 = vadd.f32 %v167_v21, %v166_v19 }
  0xeb   :  { %162 = vst.msk [vmem:[%s357_s2 + $0x4] sm:$0xf] %vm160_vm0, %v225_v20  ;;  %v184_v27 = vsel %vm165_vm1, %v180_v22, 0.0 }
  0xec   :  { %v170_v28 = vadd.f32 %v169_v24, %v168_v23  ;;  %v185_v29 = vadd.f32 %v184_v27, %v183_v25 }
  0xee   :  { %v172_v32 = vadd.f32 %v171_v31, %v170_v28  ;;  %v187_v33 = vadd.f32 %v186_v30, %v185_v29 }
  0xf0   :  { %v173_v35 = vrot.slane %v172_v32, 4  ;;  %v189_v36 = vadd.f32 %v188_v34, %v187_v33 }
  0xf2   :  { %v174_v37 = vadd.f32 %v173_v35, %v172_v32  ;;  %v190_v38 = vrot.slane %v189_v36, 4 }
  0xf4   :  { %v175_v39 = vrot.slane %v174_v37, 2  ;;  %v191_v40 = vadd.f32 %v190_v38, %v189_v36 }
  0xf6   :  { %v176_v41 = vadd.f32 %v175_v39, %v174_v37  ;;  %v192_v42 = vrot.slane %v191_v40, 2 }
  0xf8   :  { %v177_v43 = vrot.slane %v176_v41, 1  ;;  %v193_v44 = vadd.f32 %v192_v42, %v191_v40 }
  0xfa   :  { %v178_v45 = vadd.f32 %v177_v43, %v176_v41  ;;  %v194_v46 = vrot.slane %v193_v44, 1 }
  0xfc   :  { %v195_v47 = vadd.f32 %v194_v46, %v193_v44  ;;  %196 = vst.msk [vmem:[%s358_s3] sm:$0xff] %vm165_vm1, %v178_v45 }
  0xfe   :  { %197 = vst.msk [vmem:[%s359_s4] sm:$0xff] %vm165_vm1, %v195_v47 }

// kernel: _generator_forward.10
= control target key start
LH: loop header
LB: loop body
LE: loop exit
PB: predicated region body
PF: predicated region fallthrough
CT: control target
= control target key end

     0   :  { %vm72_vm4 = vcmask 125952   ;;  %s144_s0 = inlined_call_operand.vmem [shape: bf16[32,16], index: 0, kind: input, shape index: {}]   ;;  %s145_s1 = inlined_call_operand.vmem [shape: f32[1,16], index: 1, kind: input, shape index: {}]   ;;  %s146_s2 = inlined_call_operand.vmem [shape: f32[1,16], index: 2, kind: input, shape index: {}]   ;;  %s147_s3 = inlined_call_operand.vmem [shape: bf16[32,16], index: 3, kind: output, shape index: {}]  }
   0x1   :  { %v92_v0 = vld [vmem:[%s144_s0] sm:$0xff]   ;;  %v99_v4 = vld [vmem:[%s144_s0 + $0x8] sm:$0xff]  }
   0x2   :  { %v81_v1 = vld [vmem:[%s145_s1] ss:$0 sm:$0xff]  ;;  %v93_v2 = vunpack.c.l.bf16 %v92_v0  ;;  %v94_v3 = vunpack.c.h.bf16 %v92_v0  ;;  %v97_v6 = vunpack.c.l.bf16 %v99_v4  ;;  %v98_v7 = vunpack.c.h.bf16 %v99_v4 }
   0x3   :  { %v82_v5 = vld [vmem:[%s146_s2] ss:$0 sm:$0xff] }
   0x4   :  { %v29_v8 = vmul.f32 %v93_v2, %v81_v1  ;;  %v30_v9 = vmul.f32 %v94_v3, %v81_v1  ;;  %v31_v10 = vmul.f32 %v97_v6, %v81_v1  ;;  %v32_v11 = vmul.f32 %v98_v7, %v81_v1 }
   0x6   :  { %v40_v12 = vadd.f32 %v82_v5, %v29_v8  ;;  %v41_v13 = vadd.f32 %v82_v5, %v30_v9  ;;  %v42_v14 = vadd.f32 %v82_v5, %v31_v10  ;;  %v43_v15 = vadd.f32 %v82_v5, %v32_v11 }
   0x8   :  { %vm44_vm0 = vcmp.ge.f32.partialorder %v40_v12, 0.0  ;;  %v48_v16 = vmul.f32 0.2, %v40_v12  ;;  %vm45_vm1 = vcmp.ge.f32.partialorder %v41_v13, 0.0  ;;  %v49_v17 = vmul.f32 0.2, %v41_v13 }
   0x9   :  { %vm46_vm2 = vcmp.ge.f32.partialorder %v42_v14, 0.0  ;;  %v50_v18 = vmul.f32 0.2, %v42_v14  ;;  %vm47_vm3 = vcmp.ge.f32.partialorder %v43_v15, 0.0  ;;  %v51_v19 = vmul.f32 0.2, %v43_v15 }
   0xa   :  { %v52_v20 = vsel %vm44_vm0, %v40_v12, %v48_v16  ;;  %v53_v21 = vsel %vm45_vm1, %v41_v13, %v49_v17 }
   0xb   :  { %v87_v22 = vpack.c.bf16 %v52_v20, %v52_v20  ;;  %v88_v23 = vpack.c.bf16 %v53_v21, %v53_v21  ;;  %v54_v24 = vsel %vm46_vm2, %v42_v14, %v50_v18  ;;  %v55_v25 = vsel %vm47_vm3, %v43_v15, %v51_v19 }
   0xc   :  { %v89_v26 = vpack.c.bf16 %v54_v24, %v54_v24  ;;  %v90_v27 = vpack.c.bf16 %v55_v25, %v55_v25 }
   0xd   :  { %73 = vst.msk [vmem:[%s147_s3] sm:$0xf] %vm72_vm4, %v87_v22  ;;  %74 = vst.msk [vmem:[%s147_s3 + $0x4] sm:$0xf] %vm72_vm4, %v88_v23 }
   0xe   :  { %75 = vst.msk [vmem:[%s147_s3 + $0x8] sm:$0xf] %vm72_vm4, %v89_v26  ;;  %76 = vst.msk [vmem:[%s147_s3 + $0xc] sm:$0xf] %vm72_vm4, %v90_v27 }

// kernel: tile.29
= control target key start
LH: loop header
LB: loop body
LE: loop exit
PB: predicated region body
PF: predicated region fallthrough
CT: control target
= control target key end

     0   :  { %vm8_vm0 = vcmask 130048   ;;  %s40_s8 = smov 16   ;;  %s41_s9 = smov 32   ;;  %vm14_vm1 = vcmask 523648   ;;  %vm20_vm2 = vcmask 392448   ;;  %vm26_vm3 = vcmask 261248   ;;  %s58_s0 = inlined_call_operand.vmem [shape: f32[4,16], index: 0, kind: input, shape index: {}]   ;;  %s59_s1 = inlined_call_operand.vmem [shape: f32[1,64], index: 1, kind: output, shape index: {}]  }
   0x1   :  { %v5_v0 = vld [vmem:[%s58_s0] sm:$0xf]  ;;  %s39_s0 = smov 48  }
   0x2   :  { %6 = vst [vmem:[#allocation1] sm:$0xf] %v5_v0 }
   0x9   :  { %v11_v1 = vld [vmem:[#allocation1 + $0x3] sm:$0x1]   ;;  %v23_v2 = vld [vmem:[#allocation1 + $0x1] sm:$0x1]   ;;  %v7_v3 = vld [vmem:[#allocation1] sm:$0x1]  }
   0xa   :  { %12 = vrot.lane.b32.xlu0 %v11_v1, %s39_s0  ;;  %24 = vrot.lane.b32.xlu1 %v23_v2, %s40_s8  ;;  %v17_v4 = vld [vmem:[#allocation1 + $0x2] sm:$0x1]   ;;  %9 = vst.msk [vmem:[#allocation0] sm:$0x1] %vm8_vm0, %v7_v3  }
   0xe   :  { %18 = vrot.lane.b32.xlu0 %v17_v4, %s41_s9 }
  0x7c   :  { %v13_v5 = vpop.permute.xlu0 %12   ;;  %v25_v6 = vpop.permute.xlu1 %24  }
  0x7d   :  { %15 = vst.msk [vmem:[#allocation0] sm:$0x1] %vm14_vm1, %v13_v5  }
  0x80   :  { %v19_v7 = vpop.permute.xlu0 %18  }
  0x81   :  { %21 = vst.msk [vmem:[#allocation0] sm:$0x1] %vm20_vm2, %v19_v7  }
  0x82   :  { %27 = vst.msk [vmem:[#allocation0] sm:$0x1] %vm26_vm3, %v25_v6  }
  0x89   :  { %v32_v8 = vld [vmem:[#allocation0] sm:$0x1] }
  0x8a   :  { %35 = vst [vmem:[%s59_s1] sm:$0x1] %v32_v8 }

// kernel: tile.27
= control target key start
LH: loop header
LB: loop body
LE: loop exit
PB: predicated region body
PF: predicated region fallthrough
CT: control target
= control target key end

     0   :  { %s22_s0 = inlined_call_operand.vmem [shape: f32[16], index: 0, kind: input, shape index: {}]   ;;  %s23_s1 = inlined_call_operand.vmem [shape: f32[4,16], index: 1, kind: output, shape index: {}]  }
   0x1   :  { %v4_v0 = vld [vmem:[%s22_s0] ss:$0 sm:$0xff] }
   0x2   :  { %5 = vst [vmem:[%s23_s1] sm:$0xf] %v4_v0 }

// kernel: _generator_forward.11
= control target key start
LH: loop header
LB: loop body
LE: loop exit
PB: predicated region body
PF: predicated region fallthrough
CT: control target
= control target key end

     0   :  { %v288_v0 = vmov 0   ;;  %vm109_vm0 = vcmask 130048   ;;  %vm181_vm1 = vcmask 519168   ;;  %vm186_vm2 = vcmask 523264   ;;  %s385_s1 = inlined_call_operand.vmem [shape: bf16[144,64], index: 1, kind: input, shape index: {}]   ;;  %s386_s0 = inlined_call_operand.vmem [shape: bf16[32,144], index: 0, kind: input, shape index: {}]   ;;  %s387_s2 = inlined_call_operand.vmem [shape: bf16[32,64], index: 2, kind: output, shape index: {0}]   ;;  %s388_s3 = inlined_call_operand.vmem [shape: f32[8,64], index: 3, kind: output, shape index: {1}]   ;;  %s389_s4 = inlined_call_operand.vmem [shape: f32[8,64], index: 4, kind: output, shape index: {2}]  }
   0x1   :  { %116 = vmatprep.subr.bf16.mxu0 %v288_v0  ;;  %254 = vmatprep.subr.bf16.mxu1 %v288_v0  ;;  %v273_v1 = vld [vmem:[%s385_s1 + $0x38] sm:$0xff]   ;;  %v274_v2 = vld [vmem:[%s385_s1 + $0x30] sm:$0xff]   ;;  %v275_v3 = vld [vmem:[%s385_s1 + $0x28] sm:$0xff]  }
   0x2   :  { %117 = vmatpush1.bf16.msra.mxu0 %v273_v1  ;;  %263 = vmatpush1.bf16.msra.mxu1 %v273_v1  ;;  %v276_v4 = vld [vmem:[%s385_s1 + $0x20] sm:$0xff]   ;;  %v287_v6 = vld [vmem:[%s386_s0 + $0x14] ss:$8 sps:$4 sm:$0xff]   ;;  %v279_v9 = vld [vmem:[%s385_s1 + $0x8] sm:$0xff]  }
   0x3   :  { %118 = vmatprep.subr.bf16.mxu0 %v288_v0  ;;  %255 = vmatprep.subr.bf16.mxu1 %v288_v0  ;;  %v284_v5 = vld [vmem:[%s386_s0 + $0x4] ss:$8 sps:$4 sm:$0xff]   ;;  %v277_v7 = vld [vmem:[%s385_s1 + $0x18] sm:$0xff]   ;;  %v278_v8 = vld [vmem:[%s385_s1 + $0x10] sm:$0xff]  }
   0x4   :  { %244 = vmatprep.mubr.msk.bf16.mxu0 %vm109_vm0, %v284_v5  ;;  %245 = vmatprep.mubr.msk.bf16.mxu1 %vm109_vm0, %v287_v6  ;;  %v280_v10 = vld [vmem:[%s385_s1] sm:$0xff]   ;;  %v285_v13 = vld [vmem:[%s386_s0 + $0x10] ss:$8 sps:$4 sm:$0xff]  }
   0x5   :  { %v281_v11 = vld [vmem:[%s385_s1 + $0x40] sm:$0xff]  }
   0x6   :  { %119 = vmatpush1.bf16.msra.mxu0 %v274_v2  ;;  %264 = vmatpush1.bf16.msra.mxu1 %v274_v2  ;;  %v282_v12 = vld [vmem:[%s386_s0] ss:$8 sps:$4 sm:$0xff]  }
   0x7   :  { %120 = vmatprep.subr.bf16.mxu0 %v288_v0  ;;  %256 = vmatprep.subr.bf16.mxu1 %v288_v0 }
   0xa   :  { %121 = vmatpush1.bf16.msra.mxu0 %v275_v3  ;;  %265 = vmatpush1.bf16.msra.mxu1 %v275_v3 }
   0xb   :  { %122 = vmatprep.subr.bf16.mxu0 %v288_v0  ;;  %257 = vmatprep.subr.bf16.mxu1 %v288_v0 }
   0xe   :  { %123 = vmatpush1.bf16.msra.mxu0 %v276_v4  ;;  %266 = vmatpush1.bf16.msra.mxu1 %v276_v4 }
   0xf   :  { %124 = vmatprep.subr.bf16.mxu0 %v288_v0  ;;  %258 = vmatprep.subr.bf16.mxu1 %v288_v0 }
  0x12   :  { %125 = vmatpush1.bf16.msra.mxu0 %v277_v7  ;;  %267 = vmatpush1.bf16.msra.mxu1 %v277_v7 }
  0x13   :  { %126 = vmatprep.subr.bf16.mxu0 %v288_v0  ;;  %259 = vmatprep.subr.bf16.mxu1 %v288_v0 }
  0x16   :  { %127 = vmatpush1.bf16.msra.mxu0 %v278_v8  ;;  %268 = vmatpush1.bf16.msra.mxu1 %v278_v8 }
  0x17   :  { %128 = vmatprep.subr.bf16.mxu0 %v288_v0  ;;  %260 = vmatprep.subr.bf16.mxu1 %v288_v0 }
  0x1a   :  { %129 = vmatpush1.bf16.msra.mxu0 %v279_v9  ;;  %269 = vmatpush1.bf16.msra.mxu1 %v279_v9 }
  0x1b   :  { %130 = vmatprep.subr.bf16.mxu0 %v288_v0  ;;  %261 = vmatprep.subr.bf16.mxu1 %v288_v0 }
  0x1e   :  { %131 = vmatpush1.bf16.msra.mxu0 %v280_v10  ;;  %270 = vmatpush1.bf16.msra.mxu1 %v280_v10 }
  0x1f   :  { %146 = vmatprep.subr.bf16.mxu0 %v288_v0  ;;  %262 = vmatprep.subr.bf16.mxu1 %v288_v0 }
  0x22   :  { %147 = vmatpush2.bf16.msra.mxu0 %v281_v11  ;;  %271 = vmatpush2.bf16.msra.mxu1 %v281_v11 }
  0x25   :  { %149 = vmatmul.mubr.bf16.vlgmr.msra.gmra.mxu0 %v282_v12  ;;  %157 = vmatmul.mubr.bf16.vlgmr.msra.gmra.mxu1 %v285_v13 }
  0xe5   :  { %v150_v14 = vpop.f32.mrf.mxu0  ;;  %v158_v15 = vpop.f32.mrf.mxu1 }
  0xe6   :  { %v250_v16 = vpack.c.bf16 %v150_v14, %v150_v14  ;;  %v252_v17 = vpack.c.bf16 %v158_v15, %v158_v15  ;;  %v200_v20 = vmul.f32 %v150_v14, %v150_v14  ;;  %v187_v21 = vsel %vm186_vm2, %v150_v14, 0.0 }
  0xe7   :  { %v152_v18 = vpop.f32.mrf.mxu0  ;;  %v160_v19 = vpop.f32.mrf.mxu1  ;;  %v202_v22 = vmul.f32 %v158_v15, %v158_v15  ;;  %v190_v33 = vsel %vm186_vm2, %v158_v15, 0.0 }
  0xe8   :  { %182 = vst.msk [vmem:[%s387_s2] sm:$0xf] %vm181_vm1, %v250_v16  ;;  %184 = vst.msk [vmem:[%s387_s2 + $0x8] sm:$0xf] %vm181_vm1, %v252_v17  ;;  %v204_v32 = vsel %vm186_vm2, %v200_v20, 0.0 }
  0xe9   :  { %v153_v23 = vpop.f32.mrf.mxu0  ;;  %v161_v24 = vpop.f32.mrf.mxu1  ;;  %v207_v38 = vsel %vm186_vm2, %v202_v22, 0.0 }
  0xea   :  { %v251_v25 = vpack.c.bf16 %v153_v23, %v153_v23  ;;  %v188_v26 = vsel %vm186_vm2, %v153_v23, 0.0  ;;  %v201_v27 = vmul.f32 %v153_v23, %v153_v23  ;;  %v253_v28 = vpack.c.bf16 %v161_v24, %v161_v24 }
  0xeb   :  { %v189_v29 = vadd.f32 %v188_v26, %v187_v21  ;;  %v155_v30 = vpop.f32.mrf.mxu0  ;;  %v163_v31 = vpop.f32.mrf.mxu1  ;;  %v203_v35 = vmul.f32 %v161_v24, %v161_v24  ;;  %v192_v39 = vsel %vm186_vm2, %v161_v24, 0.0 }
  0xec   :  { %183 = vst.msk [vmem:[%s387_s2 + $0x4] sm:$0xf] %vm181_vm1, %v251_v25  ;;  %v205_v34 = vsel %vm186_vm2, %v201_v27, 0.0  ;;  %185 = vst.msk [vmem:[%s387_s2 + $0xc] sm:$0xf] %vm181_vm1, %v253_v28 }
  0xed   :  { %v206_v36 = vadd.f32 %v205_v34, %v204_v32  ;;  %v191_v37 = vadd.f32 %v190_v33, %v189_v29  ;;  %v209_v42 = vsel %vm186_vm2, %v203_v35, 0.0 }
  0xef   :  { %v193_v40 = vadd.f32 %v192_v39, %v191_v37  ;;  %v208_v41 = vadd.f32 %v207_v38, %v206_v36 }
  0xf1   :  { %v194_v43 = vrot.slane %v193_v40, 4  ;;  %v210_v44 = vadd.f32 %v209_v42, %v208_v41 }
  0xf3   :  { %v195_v45 = vadd.f32 %v194_v43, %v193_v40  ;;  %v211_v46 = vrot.slane %v210_v44, 4 }
  0xf5   :  { %v196_v47 = vrot.slane %v195_v45, 2  ;;  %v212_v48 = vadd.f32 %v211_v46, %v210_v44 }
  0xf7   :  { %v197_v49 = vadd.f32 %v196_v47, %v195_v45  ;;  %v213_v50 = vrot.slane %v212_v48, 2 }
  0xf9   :  { %v198_v51 = vrot.slane %v197_v49, 1  ;;  %v214_v52 = vadd.f32 %v213_v50, %v212_v48 }
  0xfb   :  { %v199_v53 = vadd.f32 %v198_v51, %v197_v49  ;;  %v215_v54 = vrot.slane %v214_v52, 1 }
  0xfd   :  { %v216_v55 = vadd.f32 %v215_v54, %v214_v52  ;;  %217 = vst.msk [vmem:[%s388_s3] sm:$0xff] %vm186_vm2, %v199_v53 }
  0xff   :  { %218 = vst.msk [vmem:[%s389_s4] sm:$0xff] %vm186_vm2, %v216_v55 }

// kernel: _generator_forward.12
= control target key start
LH: loop header
LB: loop body
LE: loop exit
PB: predicated region body
PF: predicated region fallthrough
CT: control target
= control target key end

     0   :  { %vm64_vm0 = vcmask 519168   ;;  %s136_s0 = inlined_call_operand.vmem [shape: bf16[32,64], index: 0, kind: input, shape index: {}]   ;;  %s137_s1 = inlined_call_operand.vmem [shape: f32[1,64], index: 1, kind: input, shape index: {}]   ;;  %s138_s2 = inlined_call_operand.vmem [shape: f32[1,64], index: 2, kind: input, shape index: {}]   ;;  %s139_s3 = inlined_call_operand.vmem [shape: bf16[32,64], index: 3, kind: output, shape index: {}]  }
   0x1   :  { %v84_v0 = vld [vmem:[%s136_s0] sm:$0xff]   ;;  %v91_v4 = vld [vmem:[%s136_s0 + $0x8] sm:$0xff]  }
   0x2   :  { %v73_v1 = vld [vmem:[%s137_s1] ss:$0 sm:$0xff]  ;;  %v85_v2 = vunpack.c.l.bf16 %v84_v0  ;;  %v86_v3 = vunpack.c.h.bf16 %v84_v0  ;;  %v89_v6 = vunpack.c.l.bf16 %v91_v4  ;;  %v90_v7 = vunpack.c.h.bf16 %v91_v4 }
   0x3   :  { %v74_v5 = vld [vmem:[%s138_s2] ss:$0 sm:$0xff] }
   0x4   :  { %v29_v8 = vmul.f32 %v85_v2, %v73_v1  ;;  %v30_v9 = vmul.f32 %v86_v3, %v73_v1  ;;  %v31_v10 = vmul.f32 %v89_v6, %v73_v1  ;;  %v32_v11 = vmul.f32 %v90_v7, %v73_v1 }
   0x6   :  { %v40_v12 = vadd.f32 %v74_v5, %v29_v8  ;;  %v41_v13 = vadd.f32 %v74_v5, %v30_v9  ;;  %v42_v14 = vadd.f32 %v74_v5, %v31_v10  ;;  %v43_v15 = vadd.f32 %v74_v5, %v32_v11 }
   0x8   :  { %v44_v16 = vmax.f32 %v40_v12, 0.0  ;;  %v45_v17 = vmax.f32 %v41_v13, 0.0  ;;  %v46_v18 = vmax.f32 %v42_v14, 0.0  ;;  %v47_v19 = vmax.f32 %v43_v15, 0.0 }
   0xa   :  { %v79_v20 = vpack.c.bf16 %v44_v16, %v44_v16  ;;  %v80_v21 = vpack.c.bf16 %v45_v17, %v45_v17  ;;  %v81_v22 = vpack.c.bf16 %v46_v18, %v46_v18  ;;  %v82_v23 = vpack.c.bf16 %v47_v19, %v47_v19 }
   0xc   :  { %65 = vst.msk [vmem:[%s139_s3] sm:$0xf] %vm64_vm0, %v79_v20  ;;  %66 = vst.msk [vmem:[%s139_s3 + $0x4] sm:$0xf] %vm64_vm0, %v80_v21 }
   0xd   :  { %67 = vst.msk [vmem:[%s139_s3 + $0x8] sm:$0xf] %vm64_vm0, %v81_v22  ;;  %68 = vst.msk [vmem:[%s139_s3 + $0xc] sm:$0xf] %vm64_vm0, %v82_v23 }

// kernel: tile.39
= control target key start
LH: loop header
LB: loop body
LE: loop exit
PB: predicated region body
PF: predicated region fallthrough
CT: control target
= control target key end

     0   :  { %vm8_vm0 = vcmask 64512   ;;  %s40_s8 = smov 8   ;;  %s41_s9 = smov 16   ;;  %vm14_vm1 = vcmask 261312   ;;  %vm20_vm2 = vcmask 195712   ;;  %vm26_vm3 = vcmask 130112   ;;  %s58_s0 = inlined_call_operand.vmem [shape: f32[4,8], index: 0, kind: input, shape index: {}]   ;;  %s59_s1 = inlined_call_operand.vmem [shape: f32[1,32], index: 1, kind: output, shape index: {}]  }
   0x1   :  { %v5_v0 = vld [vmem:[%s58_s0] sm:$0xf]  ;;  %s39_s0 = smov 24  }
   0x2   :  { %6 = vst [vmem:[#allocation1] sm:$0xf] %v5_v0 }
   0x9   :  { %v11_v1 = vld [vmem:[#allocation1 + $0x3] sm:$0x1]   ;;  %v23_v2 = vld [vmem:[#allocation1 + $0x1] sm:$0x1]   ;;  %v7_v3 = vld [vmem:[#allocation1] sm:$0x1]  }
   0xa   :  { %12 = vrot.lane.b32.xlu0 %v11_v1, %s39_s0  ;;  %24 = vrot.lane.b32.xlu1 %v23_v2, %s40_s8  ;;  %v17_v4 = vld [vmem:[#allocation1 + $0x2] sm:$0x1]   ;;  %9 = vst.msk [vmem:[#allocation0] sm:$0x1] %vm8_vm0, %v7_v3  }
   0xe   :  { %18 = vrot.lane.b32.xlu0 %v17_v4, %s41_s9 }
  0x7c   :  { %v13_v5 = vpop.permute.xlu0 %12   ;;  %v25_v6 = vpop.permute.xlu1 %24  }
  0x7d   :  { %15 = vst.msk [vmem:[#allocation0] sm:$0x1] %vm14_vm1, %v13_v5  }
  0x80   :  { %v19_v7 = vpop.permute.xlu0 %18  }
  0x81   :  { %21 = vst.msk [vmem:[#allocation0] sm:$0x1] %vm20_vm2, %v19_v7  }
  0x82   :  { %27 = vst.msk [vmem:[#allocation0] sm:$0x1] %vm26_vm3, %v25_v6  }
  0x89   :  { %v32_v8 = vld [vmem:[#allocation0] sm:$0x1] }
  0x8a   :  { %35 = vst [vmem:[%s59_s1] sm:$0x1] %v32_v8 }

// kernel: tile.37
= control target key start
LH: loop header
LB: loop body
LE: loop exit
PB: predicated region body
PF: predicated region fallthrough
CT: control target
= control target key end

     0   :  { %s22_s0 = inlined_call_operand.vmem [shape: f32[8], index: 0, kind: input, shape index: {}]   ;;  %s23_s1 = inlined_call_operand.vmem [shape: f32[4,8], index: 1, kind: output, shape index: {}]  }
   0x1   :  { %v4_v0 = vld [vmem:[%s22_s0] ss:$0 sm:$0xff] }
   0x2   :  { %5 = vst [vmem:[%s23_s1] sm:$0xf] %v4_v0 }

// kernel: _generator_forward.13
= control target key start
LH: loop header
LB: loop body
LE: loop exit
PB: predicated region body
PF: predicated region fallthrough
CT: control target
= control target key end

     0   :  { %v600_v0 = vmov 0   ;;  %vm175_vm0 = vcmask 130048   ;;  %vm361_vm1 = vcmask 257024   ;;  %vm378_vm2 = vcmask 261120   ;;  %s855_s1 = inlined_call_operand.vmem [shape: bf16[144,32], index: 1, kind: input, shape index: {}]   ;;  %s856_s0 = inlined_call_operand.vmem [shape: bf16[128,144], index: 0, kind: input, shape index: {}]   ;;  %s857_s2 = inlined_call_operand.vmem [shape: bf16[128,32], index: 2, kind: output, shape index: {0}]   ;;  %s858_s3 = inlined_call_operand.vmem [shape: f32[8,32], index: 3, kind: output, shape index: {1}]   ;;  %s859_s4 = inlined_call_operand.vmem [shape: f32[8,32], index: 4, kind: output, shape index: {2}]  }
   0x1   :  { %200 = vmatprep.subr.bf16.mxu0 %v600_v0  ;;  %v567_v1 = vld [vmem:[%s855_s1 + $0x38] sm:$0xff]   ;;  %548 = vmatprep.subr.bf16.mxu1 %v600_v0  ;;  %v568_v2 = vld [vmem:[%s855_s1 + $0x30] sm:$0xff]   ;;  %v569_v3 = vld [vmem:[%s855_s1 + $0x28] sm:$0xff]  }
   0x2   :  { %201 = vmatpush1.bf16.msra.mxu0 %v567_v1  ;;  %557 = vmatpush1.bf16.msra.mxu1 %v567_v1  ;;  %v570_v4 = vld [vmem:[%s855_s1 + $0x20] sm:$0xff]   ;;  %v571_v7 = vld [vmem:[%s855_s1 + $0x18] sm:$0xff]   ;;  %v572_v8 = vld [vmem:[%s855_s1 + $0x10] sm:$0xff]  }
   0x3   :  { %202 = vmatprep.subr.bf16.mxu0 %v600_v0  ;;  %549 = vmatprep.subr.bf16.mxu1 %v600_v0  ;;  %v578_v5 = vld [vmem:[%s856_s0 + $0x4] ss:$8 sps:$4 sm:$0xff]   ;;  %v576_v12 = vld [vmem:[%s856_s0] ss:$8 sps:$4 sm:$0xff]   ;;  %v579_v14 = vld [vmem:[%s856_s0 + $0x14] ss:$8 sps:$4 sm:$0xff]  }
   0x4   :  { %508 = vmatprep.mubr.msk.bf16.mxu0 %vm175_vm0, %v578_v5  ;;  %v584_v6 = vld [vmem:[%s856_s0 + $0x44] ss:$8 sps:$4 sm:$0xff]   ;;  %v582_v13 = vld [vmem:[%s856_s0 + $0x40] ss:$8 sps:$4 sm:$0xff]   ;;  %v588_v15 = vld [vmem:[%s856_s0 + $0x54] ss:$8 sps:$4 sm:$0xff]  }
   0x5   :  { %512 = vmatprep.mubr.msk.bf16.mxu1 %vm175_vm0, %v584_v6  ;;  %v573_v9 = vld [vmem:[%s855_s1 + $0x8] sm:$0xff]   ;;  %v574_v10 = vld [vmem:[%s855_s1] sm:$0xff]   ;;  %v581_v16 = vld [vmem:[%s856_s0 + $0x10] ss:$8 sps:$4 sm:$0xff]  }
   0x6   :  { %203 = vmatpush1.bf16.msra.mxu0 %v568_v2  ;;  %558 = vmatpush1.bf16.msra.mxu1 %v568_v2  ;;  %v575_v11 = vld [vmem:[%s855_s1 + $0x40] sm:$0xff]   ;;  %v590_v17 = vld [vmem:[%s856_s0 + $0x50] ss:$8 sps:$4 sm:$0xff]   ;;  %v591_v22 = vld [vmem:[%s856_s0 + $0x34] ss:$8 sps:$4 sm:$0xff]  }
   0x7   :  { %204 = vmatprep.subr.bf16.mxu0 %v600_v0  ;;  %550 = vmatprep.subr.bf16.mxu1 %v600_v0  ;;  %v585_v18 = vld [vmem:[%s856_s0 + $0x24] ss:$8 sps:$4 sm:$0xff]   ;;  %v587_v20 = vld [vmem:[%s856_s0 + $0x20] ss:$8 sps:$4 sm:$0xff]   ;;  %v597_v23 = vld [vmem:[%s856_s0 + $0x74] ss:$8 sps:$4 sm:$0xff]  }
   0x8   :  { %v594_v19 = vld [vmem:[%s856_s0 + $0x64] ss:$8 sps:$4 sm:$0xff]   ;;  %v596_v21 = vld [vmem:[%s856_s0 + $0x60] ss:$8 sps:$4 sm:$0xff]   ;;  %v593_v24 = vld [vmem:[%s856_s0 + $0x30] ss:$8 sps:$4 sm:$0xff]  }
   0x9   :  { %v599_v25 = vld [vmem:[%s856_s0 + $0x70] ss:$8 sps:$4 sm:$0xff]  }
   0xa   :  { %205 = vmatpush1.bf16.msra.mxu0 %v569_v3  ;;  %559 = vmatpush1.bf16.msra.mxu1 %v569_v3 }
   0xb   :  { %206 = vmatprep.subr.bf16.mxu0 %v600_v0  ;;  %551 = vmatprep.subr.bf16.mxu1 %v600_v0 }
   0xe   :  { %207 = vmatpush1.bf16.msra.mxu0 %v570_v4  ;;  %560 = vmatpush1.bf16.msra.mxu1 %v570_v4 }
   0xf   :  { %208 = vmatprep.subr.bf16.mxu0 %v600_v0  ;;  %552 = vmatprep.subr.bf16.mxu1 %v600_v0 }
  0x12   :  { %209 = vmatpush1.bf16.msra.mxu0 %v571_v7  ;;  %561 = vmatpush1.bf16.msra.mxu1 %v571_v7 }
  0x13   :  { %210 = vmatprep.subr.bf16.mxu0 %v600_v0  ;;  %553 = vmatprep.subr.bf16.mxu1 %v600_v0 }
  0x16   :  { %211 = vmatpush1.bf16.msra.mxu0 %v572_v8  ;;  %562 = vmatpush1.bf16.msra.mxu1 %v572_v8 }
  0x17   :  { %212 = vmatprep.subr.bf16.mxu0 %v600_v0  ;;  %554 = vmatprep.subr.bf16.mxu1 %v600_v0 }
  0x1a   :  { %213 = vmatpush1.bf16.msra.mxu0 %v573_v9  ;;  %563 = vmatpush1.bf16.msra.mxu1 %v573_v9 }
  0x1b   :  { %214 = vmatprep.subr.bf16.mxu0 %v600_v0  ;;  %555 = vmatprep.subr.bf16.mxu1 %v600_v0 }
  0x1e   :  { %215 = vmatpush1.bf16.msra.mxu0 %v574_v10  ;;  %564 = vmatpush1.bf16.msra.mxu1 %v574_v10 }
  0x1f   :  { %230 = vmatprep.subr.bf16.mxu0 %v600_v0  ;;  %556 = vmatprep.subr.bf16.mxu1 %v600_v0 }
  0x22   :  { %231 = vmatpush2.bf16.msra.mxu0 %v575_v11  ;;  %565 = vmatpush2.bf16.msra.mxu1 %v575_v11 }
  0x25   :  { %233 = vmatmul.mubr.bf16.vlgmr.msra.gmra.mxu0 %v576_v12  ;;  %265 = vmatmul.mubr.bf16.vlgmr.msra.gmra.mxu1 %v582_v13 }
  0x26   :  { %509 = vmatprep.mubr.msk.bf16.mxu0 %vm175_vm0, %v579_v14  ;;  %513 = vmatprep.mubr.msk.bf16.mxu1 %vm175_vm0, %v588_v15 }
  0x2d   :  { %241 = vmatmul.mubr.bf16.gmra.mxu0 %v581_v16  ;;  %273 = vmatmul.mubr.bf16.gmra.mxu1 %v590_v17 }
  0x2e   :  { %510 = vmatprep.mubr.msk.bf16.mxu0 %vm175_vm0, %v585_v18  ;;  %514 = vmatprep.mubr.msk.bf16.mxu1 %vm175_vm0, %v594_v19 }
  0x35   :  { %249 = vmatmul.mubr.bf16.gmra.mxu0 %v587_v20  ;;  %281 = vmatmul.mubr.bf16.gmra.mxu1 %v596_v21 }
  0x36   :  { %511 = vmatprep.mubr.msk.bf16.mxu0 %vm175_vm0, %v591_v22  ;;  %515 = vmatprep.mubr.msk.bf16.mxu1 %vm175_vm0, %v597_v23 }
  0x3d   :  { %257 = vmatmul.mubr.bf16.gmra.mxu0 %v593_v24  ;;  %289 = vmatmul.mubr.bf16.gmra.mxu1 %v599_v25 }
  0xe5   :  { %v234_v26 = vpop.f32.mrf.mxu0  ;;  %v709_v27 = vpop.f32.mrf.mxu1 }
  0xe6   :  { %v532_v28 = vpack.c.bf16 %v234_v26, %v234_v26  ;;  %v540_v29 = vpack.c.bf16 %v709_v27, %v709_v27  ;;  %v416_v51 = vmul.f32 %v234_v26, %v234_v26  ;;  %v379_v54 = vsel %vm378_vm2, %v234_v26, 0.0 }
  0xe7   :  { %v236_v30 = vpop.f32.mrf.mxu0  ;;  %v268_v31 = vpop.f32.mrf.mxu1 }
  0xe8   :  { %362 = vst.msk [vmem:[%s857_s2] sm:$0xf] %vm361_vm1, %v532_v28  ;;  %370 = vst.msk [vmem:[%s857_s2 + $0x20] sm:$0xf] %vm361_vm1, %v540_v29  ;;  %v432_v1 = vsel %vm378_vm2, %v416_v51, 0.0  ;;  %v394_v51 = vsel %vm378_vm2, %v709_v27, 0.0 }
  0xe9   :  { %v237_v32 = vpop.f32.mrf.mxu0  ;;  %v721_v33 = vpop.f32.mrf.mxu1 }
  0xea   :  { %v533_v34 = vpack.c.bf16 %v237_v32, %v237_v32  ;;  %v541_v35 = vpack.c.bf16 %v721_v33, %v721_v33  ;;  %v417_v46 = vmul.f32 %v237_v32, %v237_v32  ;;  %v380_v52 = vsel %vm378_vm2, %v237_v32, 0.0 }
  0xeb   :  { %v239_v36 = vpop.f32.mrf.mxu0  ;;  %v271_v37 = vpop.f32.mrf.mxu1  ;;  %v381_v62 = vadd.f32 %v380_v52, %v379_v54  ;;  %v425_v52 = vmul.f32 %v721_v33, %v721_v33 }
  0xec   :  { %363 = vst.msk [vmem:[%s857_s2 + $0x4] sm:$0xf] %vm361_vm1, %v533_v34  ;;  %371 = vst.msk [vmem:[%s857_s2 + $0x24] sm:$0xf] %vm361_vm1, %v541_v35  ;;  %v433_v58 = vsel %vm378_vm2, %v417_v46, 0.0  ;;  %v424_v36 = vmul.f32 %v709_v27, %v709_v27  ;;  %v396_v27 = vsel %vm378_vm2, %v721_v33, 0.0 }
  0xed   :  { %v242_v38 = vpop.f32.mrf.mxu0  ;;  %v733_v39 = vpop.f32.mrf.mxu1  ;;  %v434_v5 = vadd.f32 %v433_v58, %v432_v1 }
  0xee   :  { %v534_v40 = vpack.c.bf16 %v242_v38, %v242_v38  ;;  %v542_v41 = vpack.c.bf16 %v733_v39, %v733_v39  ;;  %v418_v53 = vmul.f32 %v242_v38, %v242_v38  ;;  %v382_v59 = vsel %vm378_vm2, %v242_v38, 0.0 }
  0xef   :  { %v244_v42 = vpop.f32.mrf.mxu0  ;;  %v276_v43 = vpop.f32.mrf.mxu1  ;;  %v383_v6 = vadd.f32 %v382_v59, %v381_v62  ;;  %v426_v58 = vmul.f32 %v733_v39, %v733_v39  ;;  %v398_v62 = vsel %vm378_vm2, %v733_v39, 0.0 }
  0xf0   :  { %364 = vst.msk [vmem:[%s857_s2 + $0x8] sm:$0xf] %vm361_vm1, %v534_v40  ;;  %372 = vst.msk [vmem:[%s857_s2 + $0x28] sm:$0xf] %vm361_vm1, %v542_v41  ;;  %v435_v2 = vsel %vm378_vm2, %v418_v53, 0.0 }
  0xf1   :  { %v245_v44 = vpop.f32.mrf.mxu0  ;;  %v745_v45 = vpop.f32.mrf.mxu1  ;;  %v436_v14 = vadd.f32 %v435_v2, %v434_v5  ;;  %v451_v2 = vsel %vm378_vm2, %v426_v58, 0.0 }
  0xf2   :  { %v535_v47 = vpack.c.bf16 %v245_v44, %v245_v44  ;;  %v543_v48 = vpack.c.bf16 %v745_v45, %v745_v45  ;;  %v419_v55 = vmul.f32 %v245_v44, %v245_v44  ;;  %v384_v3 = vsel %vm378_vm2, %v245_v44, 0.0 }
  0xf3   :  { %v247_v49 = vpop.f32.mrf.mxu0  ;;  %v279_v50 = vpop.f32.mrf.mxu1  ;;  %v385_v15 = vadd.f32 %v384_v3, %v383_v6  ;;  %v400_v33 = vsel %vm378_vm2, %v745_v45, 0.0 }
  0xf4   :  { %365 = vst.msk [vmem:[%s857_s2 + $0xc] sm:$0xf] %vm361_vm1, %v535_v47  ;;  %373 = vst.msk [vmem:[%s857_s2 + $0x2c] sm:$0xf] %vm361_vm1, %v543_v48  ;;  %v437_v7 = vsel %vm378_vm2, %v419_v55, 0.0 }
  0xf5   :  { %v250_v56 = vpop.f32.mrf.mxu0  ;;  %v759_v57 = vpop.f32.mrf.mxu1  ;;  %v438_v20 = vadd.f32 %v437_v7, %v436_v14 }
  0xf6   :  { %v536_v60 = vpack.c.bf16 %v250_v56, %v250_v56  ;;  %v544_v61 = vpack.c.bf16 %v759_v57, %v759_v57  ;;  %v420_v4 = vmul.f32 %v250_v56, %v250_v56  ;;  %v386_v10 = vsel %vm378_vm2, %v250_v56, 0.0 }
  0xf7   :  { %v252_v63 = vpop.f32.mrf.mxu0  ;;  %v284_v0 = vpop.f32.mrf.mxu1  ;;  %v387_v21 = vadd.f32 %v386_v10, %v385_v15  ;;  %v447_v56 = vsel %vm378_vm2, %v424_v36, 0.0  ;;  %v428_v3 = vmul.f32 %v759_v57, %v759_v57  ;;  %v402_v39 = vsel %vm378_vm2, %v759_v57, 0.0 }
  0xf8   :  { %366 = vst.msk [vmem:[%s857_s2 + $0x10] sm:$0xf] %vm361_vm1, %v536_v60  ;;  %374 = vst.msk [vmem:[%s857_s2 + $0x30] sm:$0xf] %vm361_vm1, %v544_v61  ;;  %v439_v18 = vsel %vm378_vm2, %v420_v4, 0.0  ;;  %v449_v61 = vsel %vm378_vm2, %v425_v52, 0.0  ;;  %v427_v63 = vmul.f32 %v745_v45, %v745_v45 }
  0xf9   :  { %v253_v8 = vpop.f32.mrf.mxu0  ;;  %v777_v9 = vpop.f32.mrf.mxu1  ;;  %v440_v30 = vadd.f32 %v439_v18, %v438_v20 }
  0xfa   :  { %v537_v11 = vpack.c.bf16 %v253_v8, %v253_v8  ;;  %v421_v12 = vmul.f32 %v253_v8, %v253_v8  ;;  %v545_v13 = vpack.c.bf16 %v777_v9, %v777_v9  ;;  %v388_v19 = vsel %vm378_vm2, %v253_v8, 0.0 }
  0xfb   :  { %v255_v16 = vpop.f32.mrf.mxu0  ;;  %v287_v17 = vpop.f32.mrf.mxu1  ;;  %v389_v31 = vadd.f32 %v388_v19, %v387_v21  ;;  %v453_v6 = vsel %vm378_vm2, %v427_v63, 0.0  ;;  %v429_v7 = vmul.f32 %v777_v9, %v777_v9  ;;  %v404_v45 = vsel %vm378_vm2, %v777_v9, 0.0 }
  0xfc   :  { %367 = vst.msk [vmem:[%s857_s2 + $0x14] sm:$0xf] %vm361_vm1, %v537_v11  ;;  %375 = vst.msk [vmem:[%s857_s2 + $0x34] sm:$0xf] %vm361_vm1, %v545_v13  ;;  %v441_v22 = vsel %vm378_vm2, %v421_v12, 0.0  ;;  %v455_v11 = vsel %vm378_vm2, %v428_v3, 0.0 }
  0xfd   :  { %v258_v23 = vpop.f32.mrf.mxu0  ;;  %v290_v24 = vpop.f32.mrf.mxu1  ;;  %v442_v37 = vadd.f32 %v441_v22, %v440_v30  ;;  %v457_v15 = vsel %vm378_vm2, %v429_v7, 0.0 }
  0xfe   :  { %v538_v25 = vpack.c.bf16 %v258_v23, %v258_v23  ;;  %v390_v26 = vsel %vm378_vm2, %v258_v23, 0.0  ;;  %v422_v28 = vmul.f32 %v258_v23, %v258_v23  ;;  %v546_v29 = vpack.c.bf16 %v290_v24, %v290_v24 }
  0xff   :  { %v260_v32 = vpop.f32.mrf.mxu0  ;;  %v292_v34 = vpop.f32.mrf.mxu1  ;;  %v391_v38 = vadd.f32 %v390_v26, %v389_v31  ;;  %v430_v12 = vmul.f32 %v290_v24, %v290_v24  ;;  %v406_v16 = vsel %vm378_vm2, %v290_v24, 0.0 }
 0x100   :  { %368 = vst.msk [vmem:[%s857_s2 + $0x18] sm:$0xf] %vm361_vm1, %v538_v25  ;;  %v443_v35 = vsel %vm378_vm2, %v422_v28, 0.0  ;;  %376 = vst.msk [vmem:[%s857_s2 + $0x38] sm:$0xf] %vm361_vm1, %v546_v29 }
 0x101   :  { %v261_v40 = vpop.f32.mrf.mxu0  ;;  %v293_v41 = vpop.f32.mrf.mxu1  ;;  %v444_v47 = vadd.f32 %v443_v35, %v442_v37  ;;  %v459_v19 = vsel %vm378_vm2, %v430_v12, 0.0 }
 0x102   :  { %v539_v42 = vpack.c.bf16 %v261_v40, %v261_v40  ;;  %v392_v43 = vsel %vm378_vm2, %v261_v40, 0.0  ;;  %v423_v44 = vmul.f32 %v261_v40, %v261_v40  ;;  %v547_v46 = vpack.c.bf16 %v293_v41, %v293_v41 }
 0x103   :  { %v393_v48 = vadd.f32 %v392_v43, %v391_v38  ;;  %v263_v49 = vpop.f32.mrf.mxu0  ;;  %v295_v50 = vpop.f32.mrf.mxu1  ;;  %v431_v17 = vmul.f32 %v293_v41, %v293_v41  ;;  %v408_v20 = vsel %vm378_vm2, %v293_v41, 0.0 }
 0x104   :  { %369 = vst.msk [vmem:[%s857_s2 + $0x1c] sm:$0xf] %vm361_vm1, %v539_v42  ;;  %v445_v53 = vsel %vm378_vm2, %v423_v44, 0.0  ;;  %377 = vst.msk [vmem:[%s857_s2 + $0x3c] sm:$0xf] %vm361_vm1, %v547_v46 }
 0x105   :  { %v395_v54 = vadd.f32 %v394_v51, %v393_v48  ;;  %v446_v55 = vadd.f32 %v445_v53, %v444_v47  ;;  %v461_v23 = vsel %vm378_vm2, %v431_v17, 0.0 }
 0x107   :  { %v397_v59 = vadd.f32 %v396_v27, %v395_v54  ;;  %v448_v60 = vadd.f32 %v447_v56, %v446_v55 }
 0x109   :  { %v450_v0 = vadd.f32 %v449_v61, %v448_v60  ;;  %v399_v1 = vadd.f32 %v398_v62, %v397_v59 }
 0x10b   :  { %v401_v4 = vadd.f32 %v400_v33, %v399_v1  ;;  %v452_v5 = vadd.f32 %v451_v2, %v450_v0 }
 0x10d   :  { %v403_v8 = vadd.f32 %v402_v39, %v401_v4  ;;  %v454_v10 = vadd.f32 %v453_v6, %v452_v5 }
 0x10f   :  { %v405_v13 = vadd.f32 %v404_v45, %v403_v8  ;;  %v456_v14 = vadd.f32 %v455_v11, %v454_v10 }
 0x111   :  { %v458_v18 = vadd.f32 %v457_v15, %v456_v14  ;;  %v407_v57 = vadd.f32 %v406_v16, %v405_v13 }
 0x113   :  { %v460_v21 = vadd.f32 %v459_v19, %v458_v18  ;;  %v409_v22 = vadd.f32 %v408_v20, %v407_v57 }
 0x115   :  { %v410_v25 = vrot.slane %v409_v22, 4  ;;  %v462_v9 = vadd.f32 %v461_v23, %v460_v21 }
 0x117   :  { %v411_v26 = vadd.f32 %v410_v25, %v409_v22  ;;  %v463_v28 = vrot.slane %v462_v9, 4 }
 0x119   :  { %v412_v29 = vrot.slane %v411_v26, 2  ;;  %v464_v30 = vadd.f32 %v463_v28, %v462_v9 }
 0x11b   :  { %v413_v31 = vadd.f32 %v412_v29, %v411_v26  ;;  %v465_v32 = vrot.slane %v464_v30, 2 }
 0x11d   :  { %v414_v24 = vrot.slane %v413_v31, 1  ;;  %v466_v34 = vadd.f32 %v465_v32, %v464_v30 }
 0x11f   :  { %v415_v35 = vadd.f32 %v414_v24, %v413_v31  ;;  %v467_v36 = vrot.slane %v466_v34, 1 }
 0x121   :  { %v468_v37 = vadd.f32 %v467_v36, %v466_v34  ;;  %469 = vst.msk [vmem:[%s858_s3] sm:$0xff] %vm378_vm2, %v415_v35 }
 0x123   :  { %470 = vst.msk [vmem:[%s859_s4] sm:$0xff] %vm378_vm2, %v468_v37 }

// kernel: _generator_forward.14
= control target key start
LH: loop header
LB: loop body
LE: loop exit
PB: predicated region body
PF: predicated region fallthrough
CT: control target
= control target key end

     0   :  { %vm172_vm0 = vcmask 257024   ;;  %s416_s0 = inlined_call_operand.vmem [shape: bf16[128,32], index: 0, kind: input, shape index: {}]   ;;  %s417_s1 = inlined_call_operand.vmem [shape: f32[1,32], index: 1, kind: input, shape index: {}]   ;;  %s418_s2 = inlined_call_operand.vmem [shape: f32[1,32], index: 2, kind: input, shape index: {}]   ;;  %s419_s3 = inlined_call_operand.vmem [shape: bf16[128,32], index: 3, kind: output, shape index: {}]  }
   0x1   :  { %v228_v0 = vld [vmem:[%s416_s0] sm:$0xff]   ;;  %v259_v4 = vld [vmem:[%s416_s0 + $0x8] sm:$0xff]   ;;  %v260_v5 = vld [vmem:[%s416_s0 + $0x10] sm:$0xff]  }
   0x2   :  { %v292_v1 = vld [vmem:[%s417_s1] ss:$0 sm:$0xff]  ;;  %v229_v2 = vunpack.c.l.bf16 %v228_v0  ;;  %v230_v3 = vunpack.c.h.bf16 %v228_v0  ;;  %v261_v6 = vld [vmem:[%s416_s0 + $0x18] sm:$0xff]   ;;  %v233_v8 = vunpack.c.l.bf16 %v259_v4  ;;  %v234_v9 = vunpack.c.h.bf16 %v259_v4  ;;  %v263_v41 = vld [vmem:[%s416_s0 + $0x28] sm:$0xff]  }
   0x3   :  { %v306_v7 = vld [vmem:[%s418_s2] ss:$0 sm:$0xff]  ;;  %v237_v10 = vunpack.c.l.bf16 %v260_v5  ;;  %v238_v11 = vunpack.c.h.bf16 %v260_v5  ;;  %v241_v14 = vunpack.c.l.bf16 %v261_v6  ;;  %v242_v15 = vunpack.c.h.bf16 %v261_v6  ;;  %v264_v42 = vld [vmem:[%s416_s0 + $0x30] sm:$0xff]   ;;  %v265_v47 = vld [vmem:[%s416_s0 + $0x38] sm:$0xff]  }
   0x4   :  { %v53_v12 = vmul.f32 %v229_v2, %v292_v1  ;;  %v54_v13 = vmul.f32 %v230_v3, %v292_v1  ;;  %v55_v16 = vmul.f32 %v233_v8, %v292_v1  ;;  %v56_v17 = vmul.f32 %v234_v9, %v292_v1  ;;  %v262_v36 = vld [vmem:[%s416_s0 + $0x20] sm:$0xff]  }
   0x5   :  { %v57_v18 = vmul.f32 %v237_v10, %v292_v1  ;;  %v58_v19 = vmul.f32 %v238_v11, %v292_v1  ;;  %v59_v22 = vmul.f32 %v241_v14, %v292_v1  ;;  %v60_v23 = vmul.f32 %v242_v15, %v292_v1 }
   0x6   :  { %v76_v20 = vadd.f32 %v306_v7, %v53_v12  ;;  %v77_v21 = vadd.f32 %v306_v7, %v54_v13  ;;  %v78_v24 = vadd.f32 %v306_v7, %v55_v16  ;;  %v79_v25 = vadd.f32 %v306_v7, %v56_v17 }
   0x7   :  { %v80_v26 = vadd.f32 %v306_v7, %v57_v18  ;;  %v81_v27 = vadd.f32 %v306_v7, %v58_v19  ;;  %v82_v30 = vadd.f32 %v306_v7, %v59_v22  ;;  %v83_v31 = vadd.f32 %v306_v7, %v60_v23 }
   0x8   :  { %v92_v28 = vmax.f32 %v76_v20, 0.0  ;;  %v93_v29 = vmax.f32 %v77_v21, 0.0  ;;  %v94_v32 = vmax.f32 %v78_v24, 0.0  ;;  %v95_v33 = vmax.f32 %v79_v25, 0.0 }
   0x9   :  { %v96_v34 = vmax.f32 %v80_v26, 0.0  ;;  %v97_v35 = vmax.f32 %v81_v27, 0.0  ;;  %v98_v39 = vmax.f32 %v82_v30, 0.0  ;;  %v99_v40 = vmax.f32 %v83_v31, 0.0 }
   0xa   :  { %v211_v37 = vpack.c.bf16 %v92_v28, %v92_v28  ;;  %v212_v38 = vpack.c.bf16 %v93_v29, %v93_v29  ;;  %v213_v43 = vpack.c.bf16 %v94_v32, %v94_v32  ;;  %v214_v44 = vpack.c.bf16 %v95_v33, %v95_v33 }
   0xb   :  { %v215_v45 = vpack.c.bf16 %v96_v34, %v96_v34  ;;  %v216_v46 = vpack.c.bf16 %v97_v35, %v97_v35  ;;  %v217_v48 = vpack.c.bf16 %v98_v39, %v98_v39  ;;  %v218_v49 = vpack.c.bf16 %v99_v40, %v99_v40 }
   0xc   :  { %173 = vst.msk [vmem:[%s419_s3] sm:$0xf] %vm172_vm0, %v211_v37  ;;  %174 = vst.msk [vmem:[%s419_s3 + $0x4] sm:$0xf] %vm172_vm0, %v212_v38  ;;  %v245_v50 = vunpack.c.l.bf16 %v262_v36  ;;  %v246_v51 = vunpack.c.h.bf16 %v262_v36  ;;  %v249_v52 = vunpack.c.l.bf16 %v263_v41  ;;  %v250_v53 = vunpack.c.h.bf16 %v263_v41 }
   0xd   :  { %175 = vst.msk [vmem:[%s419_s3 + $0x8] sm:$0xf] %vm172_vm0, %v213_v43  ;;  %176 = vst.msk [vmem:[%s419_s3 + $0xc] sm:$0xf] %vm172_vm0, %v214_v44  ;;  %v253_v54 = vunpack.c.l.bf16 %v264_v42  ;;  %v254_v55 = vunpack.c.h.bf16 %v264_v42  ;;  %v257_v58 = vunpack.c.l.bf16 %v265_v47  ;;  %v258_v59 = vunpack.c.h.bf16 %v265_v47 }
   0xe   :  { %177 = vst.msk [vmem:[%s419_s3 + $0x10] sm:$0xf] %vm172_vm0, %v215_v45  ;;  %178 = vst.msk [vmem:[%s419_s3 + $0x14] sm:$0xf] %vm172_vm0, %v216_v46  ;;  %v61_v56 = vmul.f32 %v245_v50, %v292_v1  ;;  %v62_v57 = vmul.f32 %v246_v51, %v292_v1  ;;  %v63_v60 = vmul.f32 %v249_v52, %v292_v1 }
   0xf   :  { %179 = vst.msk [vmem:[%s419_s3 + $0x18] sm:$0xf] %vm172_vm0, %v217_v48  ;;  %180 = vst.msk [vmem:[%s419_s3 + $0x1c] sm:$0xf] %vm172_vm0, %v218_v49  ;;  %v64_v61 = vmul.f32 %v250_v53, %v292_v1  ;;  %v65_v62 = vmul.f32 %v253_v54, %v292_v1  ;;  %v66_v63 = vmul.f32 %v254_v55, %v292_v1 }
  0x10   :  { %v84_v0 = vadd.f32 %v306_v7, %v61_v56  ;;  %v85_v2 = vadd.f32 %v306_v7, %v62_v57  ;;  %v67_v3 = vmul.f32 %v257_v58, %v292_v1  ;;  %v68_v4 = vmul.f32 %v258_v59, %v292_v1 }
  0x11   :  { %v86_v5 = vadd.f32 %v306_v7, %v63_v60  ;;  %v87_v6 = vadd.f32 %v306_v7, %v64_v61  ;;  %v88_v8 = vadd.f32 %v306_v7, %v65_v62  ;;  %v89_v9 = vadd.f32 %v306_v7, %v66_v63 }
  0x12   :  { %v100_v10 = vmax.f32 %v84_v0, 0.0  ;;  %v101_v11 = vmax.f32 %v85_v2, 0.0  ;;  %v90_v12 = vadd.f32 %v306_v7, %v67_v3  ;;  %v91_v13 = vadd.f32 %v306_v7, %v68_v4 }
  0x13   :  { %v102_v14 = vmax.f32 %v86_v5, 0.0  ;;  %v103_v15 = vmax.f32 %v87_v6, 0.0  ;;  %v104_v16 = vmax.f32 %v88_v8, 0.0  ;;  %v105_v17 = vmax.f32 %v89_v9, 0.0 }
  0x14   :  { %v219_v18 = vpack.c.bf16 %v100_v10, %v100_v10  ;;  %v220_v1 = vpack.c.bf16 %v101_v11, %v101_v11  ;;  %v106_v19 = vmax.f32 %v90_v12, 0.0  ;;  %v107_v20 = vmax.f32 %v91_v13, 0.0 }
  0x15   :  { %v221_v21 = vpack.c.bf16 %v102_v14, %v102_v14  ;;  %v222_v22 = vpack.c.bf16 %v103_v15, %v103_v15  ;;  %v223_v23 = vpack.c.bf16 %v104_v16, %v104_v16  ;;  %v224_v24 = vpack.c.bf16 %v105_v17, %v105_v17 }
  0x16   :  { %181 = vst.msk [vmem:[%s419_s3 + $0x20] sm:$0xf] %vm172_vm0, %v219_v18  ;;  %182 = vst.msk [vmem:[%s419_s3 + $0x24] sm:$0xf] %vm172_vm0, %v220_v1  ;;  %v225_v7 = vpack.c.bf16 %v106_v19, %v106_v19  ;;  %v226_v25 = vpack.c.bf16 %v107_v20, %v107_v20 }
  0x17   :  { %183 = vst.msk [vmem:[%s419_s3 + $0x28] sm:$0xf] %vm172_vm0, %v221_v21  ;;  %184 = vst.msk [vmem:[%s419_s3 + $0x2c] sm:$0xf] %vm172_vm0, %v222_v22 }
  0x18   :  { %185 = vst.msk [vmem:[%s419_s3 + $0x30] sm:$0xf] %vm172_vm0, %v223_v23  ;;  %186 = vst.msk [vmem:[%s419_s3 + $0x34] sm:$0xf] %vm172_vm0, %v224_v24 }
  0x19   :  { %187 = vst.msk [vmem:[%s419_s3 + $0x38] sm:$0xf] %vm172_vm0, %v225_v7  ;;  %188 = vst.msk [vmem:[%s419_s3 + $0x3c] sm:$0xf] %vm172_vm0, %v226_v25 }

// kernel: _generator_forward.15
= control target key start
LH: loop header
LB: loop body
LE: loop exit
PB: predicated region body
PF: predicated region fallthrough
CT: control target
= control target key end

     0   :  { %vm369_vm0 = vcmask 1043456   ;;  %vm272_vm1 = vcmask 588800   ;;  %vm1046_vm2 = vcmask 97280   ;;  %s2078_s1 = inlined_call_operand.vmem [shape: bf16[72,12], index: 1, kind: input, shape index: {}]   ;;  %s2079_s0 = inlined_call_operand.vmem [shape: bf16[512,72], index: 0, kind: input, shape index: {}]   ;;  %s2080_s2 = inlined_call_operand.vmem [shape: f32[512,12], index: 2, kind: output, shape index: {}]  }
   0x1   :  { %v1371_v0 = vld [vmem:[%s2078_s1 + $0x20] ss:$0 sps:$4 sm:$0xff]   ;;  %v1372_v1 = vld [vmem:[%s2078_s1 + $0x18] sm:$0xff]   ;;  %v1373_v3 = vld [vmem:[%s2078_s1 + $0x10] sm:$0xff]  }
   0x2   :  { %1369 = vmatprep.subr.msk.bf16.mxu0 %vm369_vm0, %v1371_v0  ;;  %1370 = vmatprep.subr.msk.bf16.mxu1 %vm369_vm0, %v1371_v0  ;;  %v371_v2 = vsel %vm369_vm0, %v1371_v0, 0  ;;  %v1376_v4 = vld [vmem:[%s2079_s0] sm:$0xff]   ;;  %v1374_v6 = vld [vmem:[%s2078_s1 + $0x8] sm:$0xff]   ;;  %v1380_v10 = vld [vmem:[%s2079_s0 + $0x10] sm:$0xff]  }
   0x3   :  { %1286 = vmatpush3.bf16.msra.mxu0 %v371_v2  ;;  %1364 = vmatpush3.bf16.msra.mxu1 %v371_v2  ;;  %v1377_v5 = vld [vmem:[%s2079_s0 + $0x80] sm:$0xff]   ;;  %v1378_v8 = vld [vmem:[%s2079_s0 + $0x8] sm:$0xff]   ;;  %v1381_v11 = vld [vmem:[%s2079_s0 + $0x90] sm:$0xff]  }
   0x4   :  { %1287 = vmatprep.subr.bf16.mxu0 %v1372_v1  ;;  %1360 = vmatprep.subr.bf16.mxu1 %v1372_v1  ;;  %v1375_v7 = vld [vmem:[%s2078_s1] sm:$0xff]   ;;  %v1379_v9 = vld [vmem:[%s2079_s0 + $0x88] sm:$0xff]   ;;  %v1382_v12 = vld [vmem:[%s2079_s0 + $0x18] sm:$0xff]  }
   0x5   :  { %1295 = vmatprep.mubr.msk.bf16.mxu0 %vm272_vm1, %v1376_v4  ;;  %1327 = vmatprep.mubr.msk.bf16.mxu1 %vm272_vm1, %v1377_v5  ;;  %v1383_v13 = vld [vmem:[%s2079_s0 + $0x98] sm:$0xff]   ;;  %v1384_v14 = vld [vmem:[%s2079_s0 + $0x20] sm:$0xff]   ;;  %v1386_v16 = vld [vmem:[%s2079_s0 + $0x28] sm:$0xff]  }
   0x6   :  { %v1385_v15 = vld [vmem:[%s2079_s0 + $0xa0] sm:$0xff]   ;;  %v1387_v17 = vld [vmem:[%s2079_s0 + $0xa8] sm:$0xff]   ;;  %v1388_v18 = vld [vmem:[%s2079_s0 + $0x30] sm:$0xff]  }
   0x7   :  { %1288 = vmatpush3.bf16.msra.mxu0 %v1372_v1  ;;  %1365 = vmatpush3.bf16.msra.mxu1 %v1372_v1  ;;  %v1389_v19 = vld [vmem:[%s2079_s0 + $0xb0] sm:$0xff]   ;;  %v1390_v20 = vld [vmem:[%s2079_s0 + $0x38] sm:$0xff]   ;;  %v1392_v22 = vld [vmem:[%s2079_s0 + $0x40] sm:$0xff]  }
   0x8   :  { %1289 = vmatprep.subr.bf16.mxu0 %v1373_v3  ;;  %1361 = vmatprep.subr.bf16.mxu1 %v1373_v3  ;;  %v1391_v21 = vld [vmem:[%s2079_s0 + $0xb8] sm:$0xff]   ;;  %v1393_v23 = vld [vmem:[%s2079_s0 + $0xc0] sm:$0xff]   ;;  %v1394_v24 = vld [vmem:[%s2079_s0 + $0x48] sm:$0xff]  }
   0x9   :  { %v1395_v25 = vld [vmem:[%s2079_s0 + $0xc8] sm:$0xff]   ;;  %v1396_v26 = vld [vmem:[%s2079_s0 + $0x50] sm:$0xff]   ;;  %v1398_v28 = vld [vmem:[%s2079_s0 + $0x58] sm:$0xff]  }
   0xa   :  { %v1397_v27 = vld [vmem:[%s2079_s0 + $0xd0] sm:$0xff]   ;;  %v1399_v29 = vld [vmem:[%s2079_s0 + $0xd8] sm:$0xff]   ;;  %v1400_v30 = vld [vmem:[%s2079_s0 + $0x60] sm:$0xff]  }
   0xb   :  { %1290 = vmatpush3.bf16.msra.mxu0 %v1373_v3  ;;  %1366 = vmatpush3.bf16.msra.mxu1 %v1373_v3  ;;  %v1401_v31 = vld [vmem:[%s2079_s0 + $0xe0] sm:$0xff]   ;;  %v1402_v32 = vld [vmem:[%s2079_s0 + $0x68] sm:$0xff]   ;;  %v1404_v34 = vld [vmem:[%s2079_s0 + $0x70] sm:$0xff]  }
   0xc   :  { %1291 = vmatprep.subr.bf16.mxu0 %v1374_v6  ;;  %1362 = vmatprep.subr.bf16.mxu1 %v1374_v6  ;;  %v1403_v33 = vld [vmem:[%s2079_s0 + $0xe8] sm:$0xff]   ;;  %v1405_v35 = vld [vmem:[%s2079_s0 + $0xf0] sm:$0xff]   ;;  %v1406_v36 = vld [vmem:[%s2079_s0 + $0x78] sm:$0xff]  }
   0xd   :  { %v1407_v37 = vld [vmem:[%s2079_s0 + $0xf8] sm:$0xff]  }
   0xf   :  { %1292 = vmatpush3.bf16.msra.mxu0 %v1374_v6  ;;  %1367 = vmatpush3.bf16.msra.mxu1 %v1374_v6 }
  0x10   :  { %1293 = vmatprep.subr.bf16.mxu0 %v1375_v7  ;;  %1363 = vmatprep.subr.bf16.mxu1 %v1375_v7 }
  0x13   :  { %1294 = vmatpush3.bf16.msra.mxu0 %v1375_v7  ;;  %1368 = vmatpush3.bf16.msra.mxu1 %v1375_v7 }
  0x16   :  { %1296 = vmatmul.mubr.msk.bf16.vlgmr.msra.gmra.mxu0 %vm272_vm1, %v1378_v8  ;;  %1328 = vmatmul.mubr.msk.bf16.vlgmr.msra.gmra.mxu1 %vm272_vm1, %v1379_v9 }
  0x17   :  { %1299 = vmatprep.mubr.msk.bf16.mxu0 %vm272_vm1, %v1380_v10  ;;  %1331 = vmatprep.mubr.msk.bf16.mxu1 %vm272_vm1, %v1381_v11 }
  0x1e   :  { %1300 = vmatmul.mubr.msk.bf16.gmra.mxu0 %vm272_vm1, %v1382_v12  ;;  %1332 = vmatmul.mubr.msk.bf16.gmra.mxu1 %vm272_vm1, %v1383_v13 }
  0x1f   :  { %1303 = vmatprep.mubr.msk.bf16.mxu0 %vm272_vm1, %v1384_v14  ;;  %1335 = vmatprep.mubr.msk.bf16.mxu1 %vm272_vm1, %v1385_v15 }
  0x26   :  { %1304 = vmatmul.mubr.msk.bf16.gmra.mxu0 %vm272_vm1, %v1386_v16  ;;  %1336 = vmatmul.mubr.msk.bf16.gmra.mxu1 %vm272_vm1, %v1387_v17 }
  0x27   :  { %1307 = vmatprep.mubr.msk.bf16.mxu0 %vm272_vm1, %v1388_v18  ;;  %1339 = vmatprep.mubr.msk.bf16.mxu1 %vm272_vm1, %v1389_v19 }
  0x2e   :  { %1308 = vmatmul.mubr.msk.bf16.gmra.mxu0 %vm272_vm1, %v1390_v20  ;;  %1340 = vmatmul.mubr.msk.bf16.gmra.mxu1 %vm272_vm1, %v1391_v21 }
  0x2f   :  { %1311 = vmatprep.mubr.msk.bf16.mxu0 %vm272_vm1, %v1392_v22  ;;  %1343 = vmatprep.mubr.msk.bf16.mxu1 %vm272_vm1, %v1393_v23 }
  0x36   :  { %1312 = vmatmul.mubr.msk.bf16.gmra.mxu0 %vm272_vm1, %v1394_v24  ;;  %1344 = vmatmul.mubr.msk.bf16.gmra.mxu1 %vm272_vm1, %v1395_v25 }
  0x37   :  { %1315 = vmatprep.mubr.msk.bf16.mxu0 %vm272_vm1, %v1396_v26  ;;  %1347 = vmatprep.mubr.msk.bf16.mxu1 %vm272_vm1, %v1397_v27 }
  0x3e   :  { %1316 = vmatmul.mubr.msk.bf16.gmra.mxu0 %vm272_vm1, %v1398_v28  ;;  %1348 = vmatmul.mubr.msk.bf16.gmra.mxu1 %vm272_vm1, %v1399_v29 }
  0x3f   :  { %1319 = vmatprep.mubr.msk.bf16.mxu0 %vm272_vm1, %v1400_v30  ;;  %1351 = vmatprep.mubr.msk.bf16.mxu1 %vm272_vm1, %v1401_v31 }
  0x46   :  { %1320 = vmatmul.mubr.msk.bf16.gmra.mxu0 %vm272_vm1, %v1402_v32  ;;  %1352 = vmatmul.mubr.msk.bf16.gmra.mxu1 %vm272_vm1, %v1403_v33 }
  0x47   :  { %1323 = vmatprep.mubr.msk.bf16.mxu0 %vm272_vm1, %v1404_v34  ;;  %1355 = vmatprep.mubr.msk.bf16.mxu1 %vm272_vm1, %v1405_v35 }
  0x4e   :  { %1324 = vmatmul.mubr.msk.bf16.gmra.mxu0 %vm272_vm1, %v1406_v36  ;;  %1356 = vmatmul.mubr.msk.bf16.gmra.mxu1 %vm272_vm1, %v1407_v37 }
  0xd6   :  { %v1297_v38 = vpop.f32.mrf.mxu0  ;;  %v1329_v39 = vpop.f32.mrf.mxu1 }
  0xd7   :  { %v1186_v40 = vmul.f32 -1.442695, %v1297_v38  ;;  %v1218_v41 = vmul.f32 -1.442695, %v1329_v39 }
  0xd8   :  { %v407_v42 = vpop.f32.mrf.mxu0  ;;  %v535_v43 = vpop.f32.mrf.mxu1 }
  0xd9   :  { %1408 = vpow2.f32 %v1186_v40  ;;  %v1184_v44 = vmul.f32 -1.442695, %v407_v42  ;;  %v1216_v45 = vmul.f32 -1.442695, %v535_v43 }
  0xda   :  { %1410 = vpow2.f32 %v1218_v41  ;;  %v1298_v46 = vpop.f32.mrf.mxu0  ;;  %v1330_v47 = vpop.f32.mrf.mxu1 }
  0xdb   :  { %1412 = vpow2.f32 %v1184_v44  ;;  %v1187_v48 = vmul.f32 -1.442695, %v1298_v46  ;;  %v1219_v49 = vmul.f32 -1.442695, %v1330_v47 }
  0xdc   :  { %1414 = vpow2.f32 %v1216_v45  ;;  %v410_v50 = vpop.f32.mrf.mxu0  ;;  %v538_v51 = vpop.f32.mrf.mxu1 }
  0xdd   :  { %1416 = vpow2.f32 %v1187_v48  ;;  %v1185_v52 = vmul.f32 -1.442695, %v410_v50  ;;  %v1217_v53 = vmul.f32 -1.442695, %v538_v51 }
  0xde   :  { %1418 = vpow2.f32 %v1219_v49  ;;  %v1301_v54 = vpop.f32.mrf.mxu0  ;;  %v1333_v55 = vpop.f32.mrf.mxu1 }
  0xdf   :  { %1420 = vpow2.f32 %v1185_v52  ;;  %v1190_v56 = vmul.f32 -1.442695, %v1301_v54  ;;  %v1222_v57 = vmul.f32 -1.442695, %v1333_v55 }
  0xe0   :  { %1422 = vpow2.f32 %v1217_v53  ;;  %v423_v58 = vpop.f32.mrf.mxu0  ;;  %v551_v59 = vpop.f32.mrf.mxu1 }
  0xe1   :  { %1424 = vpow2.f32 %v1190_v56  ;;  %v1188_v60 = vmul.f32 -1.442695, %v423_v58  ;;  %v1220_v61 = vmul.f32 -1.442695, %v551_v59 }
  0xe2   :  { %1426 = vpow2.f32 %v1222_v57  ;;  %v1302_v62 = vpop.f32.mrf.mxu0  ;;  %v1334_v63 = vpop.f32.mrf.mxu1 }
  0xe3   :  { %1428 = vpow2.f32 %v1188_v60  ;;  %v1191_v0 = vmul.f32 -1.442695, %v1302_v62  ;;  %v1223_v1 = vmul.f32 -1.442695, %v1334_v63 }
  0xe4   :  { %1430 = vpow2.f32 %v1220_v61  ;;  %v426_v2 = vpop.f32.mrf.mxu0  ;;  %v554_v3 = vpop.f32.mrf.mxu1 }
  0xe5   :  { %1432 = vpow2.f32 %v1191_v0  ;;  %v1189_v4 = vmul.f32 -1.442695, %v426_v2  ;;  %v1221_v5 = vmul.f32 -1.442695, %v554_v3 }
  0xe6   :  { %v1409_v6 = vpop.eup %1408  ;;  %1434 = vpow2.f32 %v1223_v1  ;;  %v1305_v7 = vpop.f32.mrf.mxu0 }
  0xe7   :  { %v1337_v8 = vpop.f32.mrf.mxu1  ;;  %v1411_v9 = vpop.eup %1410  ;;  %v856_v10 = vadd.f32 1.0, %v1409_v6  ;;  %1436 = vpow2.f32 %v1189_v4  ;;  %v1194_v46 = vmul.f32 -1.442695, %v1305_v7 }
  0xe8   :  { %v1413_v11 = vpop.eup %1412  ;;  %v888_v12 = vadd.f32 1.0, %v1411_v9  ;;  %1438 = vpow2.f32 %v1221_v5  ;;  %v439_v13 = vpop.f32.mrf.mxu0  ;;  %v1226_v50 = vmul.f32 -1.442695, %v1337_v8 }
  0xe9   :  { %v1415_v14 = vpop.eup %1414  ;;  %1440 = vrcp.f32 %v856_v10  ;;  %v854_v15 = vadd.f32 1.0, %v1413_v11  ;;  %v567_v16 = vpop.f32.mrf.mxu1  ;;  %v1192_v52 = vmul.f32 -1.442695, %v439_v13 }
  0xea   :  { %v1417_v17 = vpop.eup %1416  ;;  %1442 = vrcp.f32 %v888_v12  ;;  %v886_v18 = vadd.f32 1.0, %v1415_v14  ;;  %v1306_v23 = vpop.f32.mrf.mxu0  ;;  %v1224_v54 = vmul.f32 -1.442695, %v567_v16 }
  0xeb   :  { %v1419_v19 = vpop.eup %1418  ;;  %1444 = vrcp.f32 %v854_v15  ;;  %v857_v20 = vadd.f32 1.0, %v1417_v17  ;;  %v1338_v26 = vpop.f32.mrf.mxu1  ;;  %v1195_v57 = vmul.f32 -1.442695, %v1306_v23 }
  0xec   :  { %v1421_v21 = vpop.eup %1420  ;;  %1446 = vrcp.f32 %v886_v18  ;;  %v889_v22 = vadd.f32 1.0, %v1419_v19  ;;  %v442_v33 = vpop.f32.mrf.mxu0  ;;  %v1227_v60 = vmul.f32 -1.442695, %v1338_v26 }
  0xed   :  { %v1423_v24 = vpop.eup %1422  ;;  %1448 = vrcp.f32 %v857_v20  ;;  %v855_v25 = vadd.f32 1.0, %v1421_v21  ;;  %v570_v36 = vpop.f32.mrf.mxu1  ;;  %v1193_v62 = vmul.f32 -1.442695, %v442_v33 }
  0xee   :  { %v1425_v27 = vpop.eup %1424  ;;  %1450 = vrcp.f32 %v889_v22  ;;  %v887_v28 = vadd.f32 1.0, %v1423_v24  ;;  %v1309_v43 = vpop.f32.mrf.mxu0  ;;  %v1225_v0 = vmul.f32 -1.442695, %v570_v36 }
  0xef   :  { %v1427_v29 = vpop.eup %1426  ;;  %1452 = vrcp.f32 %v855_v25  ;;  %v860_v30 = vadd.f32 1.0, %v1425_v27  ;;  %v1341_v47 = vpop.f32.mrf.mxu1  ;;  %v1198_v3 = vmul.f32 -1.442695, %v1309_v43 }
  0xf0   :  { %v1429_v31 = vpop.eup %1428  ;;  %1454 = vrcp.f32 %v887_v28  ;;  %v892_v32 = vadd.f32 1.0, %v1427_v29  ;;  %v455_v55 = vpop.f32.mrf.mxu0  ;;  %v1230_v6 = vmul.f32 -1.442695, %v1341_v47 }
  0xf1   :  { %v1431_v34 = vpop.eup %1430  ;;  %1456 = vrcp.f32 %v860_v30  ;;  %v858_v35 = vadd.f32 1.0, %v1429_v31  ;;  %v583_v58 = vpop.f32.mrf.mxu1  ;;  %v1196_v8 = vmul.f32 -1.442695, %v455_v55 }
  0xf2   :  { %v1433_v37 = vpop.eup %1432  ;;  %1458 = vrcp.f32 %v892_v32  ;;  %v890_v38 = vadd.f32 1.0, %v1431_v34  ;;  %v1310_v1 = vpop.f32.mrf.mxu0  ;;  %v1228_v10 = vmul.f32 -1.442695, %v583_v58 }
  0xf3   :  { %v1435_v39 = vpop.eup %1434  ;;  %1460 = vrcp.f32 %v858_v35  ;;  %v861_v40 = vadd.f32 1.0, %v1433_v37  ;;  %v1342_v4 = vpop.f32.mrf.mxu1  ;;  %v1199_v13 = vmul.f32 -1.442695, %v1310_v1 }
  0xf4   :  { %v1437_v41 = vpop.eup %1436  ;;  %1462 = vrcp.f32 %v890_v38  ;;  %v893_v42 = vadd.f32 1.0, %v1435_v39  ;;  %v458_v11 = vpop.f32.mrf.mxu0  ;;  %v1231_v16 = vmul.f32 -1.442695, %v1342_v4 }
  0xf5   :  { %v1439_v44 = vpop.eup %1438  ;;  %1464 = vrcp.f32 %v861_v40  ;;  %v859_v45 = vadd.f32 1.0, %v1437_v41  ;;  %v586_v14 = vpop.f32.mrf.mxu1  ;;  %v1197_v18 = vmul.f32 -1.442695, %v458_v11 }
  0xf6   :  { %v1441_v48 = vpop.eup %1440  ;;  %1466 = vrcp.f32 %v893_v42  ;;  %v891_v49 = vadd.f32 1.0, %v1439_v44  ;;  %v1229_v20 = vmul.f32 -1.442695, %v586_v14  ;;  %v1313_v21 = vpop.f32.mrf.mxu0 }
  0xf7   :  { %v1443_v51 = vpop.eup %1442  ;;  %1049 = vst.msk [vmem:[%s2080_s2 + $0x10] sm:$0xff] %vm1046_vm2, %v1441_v48  ;;  %1468 = vrcp.f32 %v859_v45  ;;  %v1345_v23 = vpop.f32.mrf.mxu1 }
  0xf8   :  { %v1445_v53 = vpop.eup %1444  ;;  %1081 = vst.msk [vmem:[%s2080_s2 + $0x110] sm:$0xff] %vm1046_vm2, %v1443_v51  ;;  %1470 = vrcp.f32 %v891_v49  ;;  %v471_v29 = vpop.f32.mrf.mxu0 }
  0xf9   :  { %v1447_v56 = vpop.eup %1446  ;;  %1047 = vst.msk [vmem:[%s2080_s2] sm:$0xff] %vm1046_vm2, %v1445_v53  ;;  %1472 = vpow2.f32 %v1194_v46  ;;  %v599_v32 = vpop.f32.mrf.mxu1  ;;  %v1200_v4 = vmul.f32 -1.442695, %v471_v29 }
  0xfa   :  { %v1449_v59 = vpop.eup %1448  ;;  %1079 = vst.msk [vmem:[%s2080_s2 + $0x100] sm:$0xff] %vm1046_vm2, %v1447_v56  ;;  %1474 = vpow2.f32 %v1226_v50  ;;  %v1314_v39 = vpop.f32.mrf.mxu0 }
  0xfb   :  { %v1451_v61 = vpop.eup %1450  ;;  %1050 = vst.msk [vmem:[%s2080_s2 + $0x18] sm:$0xff] %vm1046_vm2, %v1449_v59  ;;  %1476 = vpow2.f32 %v1192_v52  ;;  %v1346_v42 = vpop.f32.mrf.mxu1 }
  0xfc   :  { %v1453_v63 = vpop.eup %1452  ;;  %1082 = vst.msk [vmem:[%s2080_s2 + $0x118] sm:$0xff] %vm1046_vm2, %v1451_v61  ;;  %1478 = vpow2.f32 %v1224_v54  ;;  %v474_v49 = vpop.f32.mrf.mxu0 }
  0xfd   :  { %v1455_v2 = vpop.eup %1454  ;;  %1048 = vst.msk [vmem:[%s2080_s2 + $0x8] sm:$0xff] %vm1046_vm2, %v1453_v63  ;;  %1480 = vpow2.f32 %v1195_v57  ;;  %v602_v52 = vpop.f32.mrf.mxu1  ;;  %v1201_v14 = vmul.f32 -1.442695, %v474_v49 }
  0xfe   :  { %v1457_v5 = vpop.eup %1456  ;;  %1080 = vst.msk [vmem:[%s2080_s2 + $0x108] sm:$0xff] %vm1046_vm2, %v1455_v2  ;;  %1482 = vpow2.f32 %v1227_v60  ;;  %v1317_v59 = vpop.f32.mrf.mxu0  ;;  %v1234_v2 = vmul.f32 -1.442695, %v1345_v23 }
  0xff   :  { %v1459_v7 = vpop.eup %1458  ;;  %1053 = vst.msk [vmem:[%s2080_s2 + $0x30] sm:$0xff] %vm1046_vm2, %v1457_v5  ;;  %1484 = vpow2.f32 %v1193_v62  ;;  %v1202_v62 = vmul.f32 -1.442695, %v1313_v21  ;;  %v1349_v63 = vpop.f32.mrf.mxu1 }
 0x100   :  { %v1461_v9 = vpop.eup %1460  ;;  %1085 = vst.msk [vmem:[%s2080_s2 + $0x130] sm:$0xff] %vm1046_vm2, %v1459_v7  ;;  %1486 = vpow2.f32 %v1225_v0  ;;  %v487_v7 = vpop.f32.mrf.mxu0 }
 0x101   :  { %v1463_v12 = vpop.eup %1462  ;;  %1051 = vst.msk [vmem:[%s2080_s2 + $0x20] sm:$0xff] %vm1046_vm2, %v1461_v9  ;;  %1488 = vpow2.f32 %v1198_v3  ;;  %v1203_v9 = vmul.f32 -1.442695, %v1314_v39 }
 0x102   :  { %v1465_v15 = vpop.eup %1464  ;;  %1083 = vst.msk [vmem:[%s2080_s2 + $0x120] sm:$0xff] %vm1046_vm2, %v1463_v12  ;;  %1490 = vpow2.f32 %v1230_v6  ;;  %v1232_v6 = vmul.f32 -1.442695, %v599_v32  ;;  %v1235_v12 = vmul.f32 -1.442695, %v1346_v42 }
 0x103   :  { %v1467_v17 = vpop.eup %1466  ;;  %1054 = vst.msk [vmem:[%s2080_s2 + $0x38] sm:$0xff] %vm1046_vm2, %v1465_v15  ;;  %1492 = vpow2.f32 %v1196_v8 }
 0x104   :  { %v1469_v19 = vpop.eup %1468  ;;  %1086 = vst.msk [vmem:[%s2080_s2 + $0x138] sm:$0xff] %vm1046_vm2, %v1467_v17  ;;  %1494 = vpow2.f32 %v1228_v10  ;;  %v615_v10 = vpop.f32.mrf.mxu1 }
 0x105   :  { %v1471_v22 = vpop.eup %1470  ;;  %1052 = vst.msk [vmem:[%s2080_s2 + $0x28] sm:$0xff] %vm1046_vm2, %v1469_v19  ;;  %1496 = vpow2.f32 %v1199_v13  ;;  %v1318_v17 = vpop.f32.mrf.mxu0  ;;  %v1206_v19 = vmul.f32 -1.442695, %v1317_v59 }
 0x106   :  { %v1473_v24 = vpop.eup %1472  ;;  %1084 = vst.msk [vmem:[%s2080_s2 + $0x128] sm:$0xff] %vm1046_vm2, %v1471_v22  ;;  %1498 = vpow2.f32 %v1231_v16  ;;  %v1233_v16 = vmul.f32 -1.442695, %v602_v52  ;;  %v1238_v22 = vmul.f32 -1.442695, %v1349_v63 }
 0x107   :  { %v1475_v25 = vpop.eup %1474  ;;  %v864_v26 = vadd.f32 1.0, %v1473_v24  ;;  %1500 = vpow2.f32 %v1197_v18  ;;  %v1204_v24 = vmul.f32 -1.442695, %v487_v7  ;;  %v1207_v29 = vmul.f32 -1.442695, %v1318_v17 }
 0x108   :  { %v1477_v27 = vpop.eup %1476  ;;  %v896_v28 = vadd.f32 1.0, %v1475_v25  ;;  %1502 = vpow2.f32 %v1229_v20  ;;  %v1350_v20 = vpop.f32.mrf.mxu1 }
 0x109   :  { %v1479_v30 = vpop.eup %1478  ;;  %1504 = vrcp.f32 %v864_v26  ;;  %v862_v31 = vadd.f32 1.0, %v1477_v27  ;;  %v1236_v26 = vmul.f32 -1.442695, %v615_v10  ;;  %v490_v27 = vpop.f32.mrf.mxu0  ;;  %v1239_v32 = vmul.f32 -1.442695, %v1350_v20 }
 0x10a   :  { %v1481_v33 = vpop.eup %1480  ;;  %1506 = vrcp.f32 %v896_v28  ;;  %v894_v34 = vadd.f32 1.0, %v1479_v30  ;;  %v618_v30 = vpop.f32.mrf.mxu1 }
 0x10b   :  { %v1483_v35 = vpop.eup %1482  ;;  %1508 = vrcp.f32 %v862_v31  ;;  %v865_v36 = vadd.f32 1.0, %v1481_v33 }
 0x10c   :  { %v1485_v37 = vpop.eup %1484  ;;  %1510 = vrcp.f32 %v894_v34  ;;  %v897_v38 = vadd.f32 1.0, %v1483_v35  ;;  %v1205_v34 = vmul.f32 -1.442695, %v490_v27  ;;  %v1353_v39 = vpop.f32.mrf.mxu1 }
 0x10d   :  { %v1487_v40 = vpop.eup %1486  ;;  %1512 = vrcp.f32 %v865_v36  ;;  %v863_v41 = vadd.f32 1.0, %v1485_v37  ;;  %v1237_v36 = vmul.f32 -1.442695, %v618_v30  ;;  %v1321_v37 = vpop.f32.mrf.mxu0 }
 0x10e   :  { %v1489_v43 = vpop.eup %1488  ;;  %1514 = vrcp.f32 %v897_v38  ;;  %v895_v44 = vadd.f32 1.0, %v1487_v40 }
 0x10f   :  { %v1491_v45 = vpop.eup %1490  ;;  %1516 = vrcp.f32 %v863_v41  ;;  %v868_v46 = vadd.f32 1.0, %v1489_v43 }
 0x110   :  { %v1493_v47 = vpop.eup %1492  ;;  %1518 = vrcp.f32 %v895_v44  ;;  %v900_v48 = vadd.f32 1.0, %v1491_v45  ;;  %v503_v45 = vpop.f32.mrf.mxu0 }
 0x111   :  { %v1495_v50 = vpop.eup %1494  ;;  %1520 = vrcp.f32 %v868_v46  ;;  %v866_v51 = vadd.f32 1.0, %v1493_v47  ;;  %v1208_v20 = vmul.f32 -1.442695, %v503_v45 }
 0x112   :  { %v1497_v53 = vpop.eup %1496  ;;  %1522 = vrcp.f32 %v900_v48  ;;  %v898_v54 = vadd.f32 1.0, %v1495_v50  ;;  %v631_v48 = vpop.f32.mrf.mxu1 }
 0x113   :  { %v1499_v55 = vpop.eup %1498  ;;  %1524 = vrcp.f32 %v866_v51  ;;  %v869_v56 = vadd.f32 1.0, %v1497_v53 }
 0x114   :  { %v1501_v57 = vpop.eup %1500  ;;  %1526 = vrcp.f32 %v898_v54  ;;  %v901_v58 = vadd.f32 1.0, %v1499_v55  ;;  %v1322_v55 = vpop.f32.mrf.mxu0 }
 0x115   :  { %v1503_v60 = vpop.eup %1502  ;;  %1528 = vrcp.f32 %v869_v56  ;;  %v867_v61 = vadd.f32 1.0, %v1501_v57 }
 0x116   :  { %v1505_v0 = vpop.eup %1504  ;;  %1530 = vrcp.f32 %v901_v58  ;;  %v899_v1 = vadd.f32 1.0, %v1503_v60  ;;  %v1354_v58 = vpop.f32.mrf.mxu1 }
 0x117   :  { %v1507_v3 = vpop.eup %1506  ;;  %1057 = vst.msk [vmem:[%s2080_s2 + $0x50] sm:$0xff] %vm1046_vm2, %v1505_v0  ;;  %1532 = vrcp.f32 %v867_v61 }
 0x118   :  { %v1509_v5 = vpop.eup %1508  ;;  %1089 = vst.msk [vmem:[%s2080_s2 + $0x150] sm:$0xff] %vm1046_vm2, %v1507_v3  ;;  %1534 = vrcp.f32 %v899_v1  ;;  %v506_v1 = vpop.f32.mrf.mxu0 }
 0x119   :  { %v1511_v8 = vpop.eup %1510  ;;  %1055 = vst.msk [vmem:[%s2080_s2 + $0x40] sm:$0xff] %vm1046_vm2, %v1509_v5  ;;  %1536 = vpow2.f32 %v1202_v62  ;;  %v1209_v30 = vmul.f32 -1.442695, %v506_v1 }
 0x11a   :  { %v1513_v11 = vpop.eup %1512  ;;  %1087 = vst.msk [vmem:[%s2080_s2 + $0x140] sm:$0xff] %vm1046_vm2, %v1511_v8  ;;  %1538 = vpow2.f32 %v1234_v2 }
 0x11b   :  { %v1515_v13 = vpop.eup %1514  ;;  %1058 = vst.msk [vmem:[%s2080_s2 + $0x58] sm:$0xff] %vm1046_vm2, %v1513_v11  ;;  %1540 = vpow2.f32 %v1200_v4  ;;  %v634_v4 = vpop.f32.mrf.mxu1 }
 0x11c   :  { %v1517_v15 = vpop.eup %1516  ;;  %1090 = vst.msk [vmem:[%s2080_s2 + $0x158] sm:$0xff] %vm1046_vm2, %v1515_v13  ;;  %1542 = vpow2.f32 %v1232_v6  ;;  %v1325_v11 = vpop.f32.mrf.mxu0 }
 0x11d   :  { %v1519_v18 = vpop.eup %1518  ;;  %1056 = vst.msk [vmem:[%s2080_s2 + $0x48] sm:$0xff] %vm1046_vm2, %v1517_v15  ;;  %1544 = vpow2.f32 %v1203_v9  ;;  %v1357_v15 = vpop.f32.mrf.mxu1 }
 0x11e   :  { %v1521_v21 = vpop.eup %1520  ;;  %1088 = vst.msk [vmem:[%s2080_s2 + $0x148] sm:$0xff] %vm1046_vm2, %v1519_v18  ;;  %1546 = vpow2.f32 %v1235_v12  ;;  %v1242_v18 = vmul.f32 -1.442695, %v1353_v39 }
 0x11f   :  { %v1523_v23 = vpop.eup %1522  ;;  %1061 = vst.msk [vmem:[%s2080_s2 + $0x70] sm:$0xff] %vm1046_vm2, %v1521_v21  ;;  %1548 = vpow2.f32 %v1201_v14  ;;  %v1210_v14 = vmul.f32 -1.442695, %v1321_v37 }
 0x120   :  { %v1525_v25 = vpop.eup %1524  ;;  %1093 = vst.msk [vmem:[%s2080_s2 + $0x170] sm:$0xff] %vm1046_vm2, %v1523_v23  ;;  %1550 = vpow2.f32 %v1233_v16  ;;  %v519_v23 = vpop.f32.mrf.mxu0 }
 0x121   :  { %v1527_v28 = vpop.eup %1526  ;;  %1059 = vst.msk [vmem:[%s2080_s2 + $0x60] sm:$0xff] %vm1046_vm2, %v1525_v25  ;;  %1552 = vpow2.f32 %v1206_v19  ;;  %v1211_v25 = vmul.f32 -1.442695, %v1322_v55 }
 0x122   :  { %v1529_v31 = vpop.eup %1528  ;;  %1091 = vst.msk [vmem:[%s2080_s2 + $0x160] sm:$0xff] %vm1046_vm2, %v1527_v28  ;;  %1554 = vpow2.f32 %v1238_v22  ;;  %v1240_v22 = vmul.f32 -1.442695, %v631_v48  ;;  %v1243_v28 = vmul.f32 -1.442695, %v1354_v58 }
 0x123   :  { %v1531_v33 = vpop.eup %1530  ;;  %1062 = vst.msk [vmem:[%s2080_s2 + $0x78] sm:$0xff] %vm1046_vm2, %v1529_v31  ;;  %1556 = vpow2.f32 %v1204_v24 }
 0x124   :  { %v1533_v35 = vpop.eup %1532  ;;  %1094 = vst.msk [vmem:[%s2080_s2 + $0x178] sm:$0xff] %vm1046_vm2, %v1531_v33  ;;  %1558 = vpow2.f32 %v1236_v26  ;;  %v647_v26 = vpop.f32.mrf.mxu1 }
 0x125   :  { %v1535_v38 = vpop.eup %1534  ;;  %1060 = vst.msk [vmem:[%s2080_s2 + $0x68] sm:$0xff] %vm1046_vm2, %v1533_v35  ;;  %1560 = vpow2.f32 %v1207_v29  ;;  %v1326_v33 = vpop.f32.mrf.mxu0  ;;  %v1214_v35 = vmul.f32 -1.442695, %v1325_v11 }
 0x126   :  { %v1537_v40 = vpop.eup %1536  ;;  %1092 = vst.msk [vmem:[%s2080_s2 + $0x168] sm:$0xff] %vm1046_vm2, %v1535_v38  ;;  %1562 = vpow2.f32 %v1239_v32  ;;  %v1241_v32 = vmul.f32 -1.442695, %v634_v4  ;;  %v1246_v38 = vmul.f32 -1.442695, %v1357_v15 }
 0x127   :  { %v1539_v41 = vpop.eup %1538  ;;  %v872_v42 = vadd.f32 1.0, %v1537_v40  ;;  %1564 = vpow2.f32 %v1205_v34  ;;  %v1212_v40 = vmul.f32 -1.442695, %v519_v23  ;;  %v1215_v45 = vmul.f32 -1.442695, %v1326_v33 }
 0x128   :  { %v1541_v43 = vpop.eup %1540  ;;  %v904_v44 = vadd.f32 1.0, %v1539_v41  ;;  %1566 = vpow2.f32 %v1237_v36  ;;  %v1358_v36 = vpop.f32.mrf.mxu1 }
 0x129   :  { %v1543_v46 = vpop.eup %1542  ;;  %1568 = vrcp.f32 %v872_v42  ;;  %v870_v47 = vadd.f32 1.0, %v1541_v43  ;;  %v1244_v42 = vmul.f32 -1.442695, %v647_v26  ;;  %v522_v43 = vpop.f32.mrf.mxu0  ;;  %v1247_v48 = vmul.f32 -1.442695, %v1358_v36 }
 0x12a   :  { %v1545_v49 = vpop.eup %1544  ;;  %1570 = vrcp.f32 %v904_v44  ;;  %v902_v50 = vadd.f32 1.0, %v1543_v46  ;;  %v650_v46 = vpop.f32.mrf.mxu1 }
 0x12b   :  { %v1547_v51 = vpop.eup %1546  ;;  %1572 = vrcp.f32 %v870_v47  ;;  %v873_v52 = vadd.f32 1.0, %v1545_v49 }
 0x12c   :  { %v1549_v53 = vpop.eup %1548  ;;  %1574 = vrcp.f32 %v902_v50  ;;  %v905_v54 = vadd.f32 1.0, %v1547_v51  ;;  %v1213_v50 = vmul.f32 -1.442695, %v522_v43 }
 0x12d   :  { %v1551_v56 = vpop.eup %1550  ;;  %1576 = vrcp.f32 %v873_v52  ;;  %v871_v57 = vadd.f32 1.0, %v1549_v53  ;;  %v1245_v52 = vmul.f32 -1.442695, %v650_v46 }
 0x12e   :  { %v1553_v59 = vpop.eup %1552  ;;  %1578 = vrcp.f32 %v905_v54  ;;  %v903_v60 = vadd.f32 1.0, %v1551_v56 }
 0x12f   :  { %v1555_v61 = vpop.eup %1554  ;;  %1580 = vrcp.f32 %v871_v57  ;;  %v876_v62 = vadd.f32 1.0, %v1553_v59 }
 0x130   :  { %v1557_v63 = vpop.eup %1556  ;;  %1582 = vrcp.f32 %v903_v60  ;;  %v908_v0 = vadd.f32 1.0, %v1555_v61 }
 0x131   :  { %v1559_v2 = vpop.eup %1558  ;;  %1584 = vrcp.f32 %v876_v62  ;;  %v874_v3 = vadd.f32 1.0, %v1557_v63 }
 0x132   :  { %v1561_v5 = vpop.eup %1560  ;;  %1586 = vrcp.f32 %v908_v0  ;;  %v906_v6 = vadd.f32 1.0, %v1559_v2 }
 0x133   :  { %v1563_v7 = vpop.eup %1562  ;;  %1588 = vrcp.f32 %v874_v3  ;;  %v877_v8 = vadd.f32 1.0, %v1561_v5 }
 0x134   :  { %v1565_v9 = vpop.eup %1564  ;;  %1590 = vrcp.f32 %v906_v6  ;;  %v909_v10 = vadd.f32 1.0, %v1563_v7 }
 0x135   :  { %v1567_v12 = vpop.eup %1566  ;;  %1592 = vrcp.f32 %v877_v8  ;;  %v875_v13 = vadd.f32 1.0, %v1565_v9 }
 0x136   :  { %v1569_v16 = vpop.eup %1568  ;;  %1594 = vrcp.f32 %v909_v10  ;;  %v907_v17 = vadd.f32 1.0, %v1567_v12 }
 0x137   :  { %v1571_v19 = vpop.eup %1570  ;;  %1065 = vst.msk [vmem:[%s2080_s2 + $0x90] sm:$0xff] %vm1046_vm2, %v1569_v16  ;;  %1596 = vrcp.f32 %v875_v13 }
 0x138   :  { %v1573_v21 = vpop.eup %1572  ;;  %1097 = vst.msk [vmem:[%s2080_s2 + $0x190] sm:$0xff] %vm1046_vm2, %v1571_v19  ;;  %1598 = vrcp.f32 %v907_v17 }
 0x139   :  { %v1575_v24 = vpop.eup %1574  ;;  %1063 = vst.msk [vmem:[%s2080_s2 + $0x80] sm:$0xff] %vm1046_vm2, %v1573_v21  ;;  %1600 = vpow2.f32 %v1210_v14 }
 0x13a   :  { %v1577_v27 = vpop.eup %1576  ;;  %1095 = vst.msk [vmem:[%s2080_s2 + $0x180] sm:$0xff] %vm1046_vm2, %v1575_v24  ;;  %1602 = vpow2.f32 %v1242_v18 }
 0x13b   :  { %v1579_v29 = vpop.eup %1578  ;;  %1066 = vst.msk [vmem:[%s2080_s2 + $0x98] sm:$0xff] %vm1046_vm2, %v1577_v27  ;;  %1604 = vpow2.f32 %v1208_v20 }
 0x13c   :  { %v1581_v31 = vpop.eup %1580  ;;  %1098 = vst.msk [vmem:[%s2080_s2 + $0x198] sm:$0xff] %vm1046_vm2, %v1579_v29  ;;  %1606 = vpow2.f32 %v1240_v22 }
 0x13d   :  { %v1583_v34 = vpop.eup %1582  ;;  %1064 = vst.msk [vmem:[%s2080_s2 + $0x88] sm:$0xff] %vm1046_vm2, %v1581_v31  ;;  %1608 = vpow2.f32 %v1211_v25 }
 0x13e   :  { %v1585_v37 = vpop.eup %1584  ;;  %1096 = vst.msk [vmem:[%s2080_s2 + $0x188] sm:$0xff] %vm1046_vm2, %v1583_v34  ;;  %1610 = vpow2.f32 %v1243_v28 }
 0x13f   :  { %v1587_v39 = vpop.eup %1586  ;;  %1069 = vst.msk [vmem:[%s2080_s2 + $0xb0] sm:$0xff] %vm1046_vm2, %v1585_v37  ;;  %1612 = vpow2.f32 %v1209_v30 }
 0x140   :  { %v1589_v41 = vpop.eup %1588  ;;  %1101 = vst.msk [vmem:[%s2080_s2 + $0x1b0] sm:$0xff] %vm1046_vm2, %v1587_v39  ;;  %1614 = vpow2.f32 %v1241_v32 }
 0x141   :  { %v1591_v44 = vpop.eup %1590  ;;  %1067 = vst.msk [vmem:[%s2080_s2 + $0xa0] sm:$0xff] %vm1046_vm2, %v1589_v41  ;;  %1616 = vpow2.f32 %v1214_v35 }
 0x142   :  { %v1593_v47 = vpop.eup %1592  ;;  %1099 = vst.msk [vmem:[%s2080_s2 + $0x1a0] sm:$0xff] %vm1046_vm2, %v1591_v44  ;;  %1618 = vpow2.f32 %v1246_v38 }
 0x143   :  { %v1595_v49 = vpop.eup %1594  ;;  %1070 = vst.msk [vmem:[%s2080_s2 + $0xb8] sm:$0xff] %vm1046_vm2, %v1593_v47  ;;  %1620 = vpow2.f32 %v1212_v40 }
 0x144   :  { %v1597_v51 = vpop.eup %1596  ;;  %1102 = vst.msk [vmem:[%s2080_s2 + $0x1b8] sm:$0xff] %vm1046_vm2, %v1595_v49  ;;  %1622 = vpow2.f32 %v1244_v42 }
 0x145   :  { %v1599_v53 = vpop.eup %1598  ;;  %1068 = vst.msk [vmem:[%s2080_s2 + $0xa8] sm:$0xff] %vm1046_vm2, %v1597_v51  ;;  %1624 = vpow2.f32 %v1215_v45 }
 0x146   :  { %v1601_v54 = vpop.eup %1600  ;;  %1100 = vst.msk [vmem:[%s2080_s2 + $0x1a8] sm:$0xff] %vm1046_vm2, %v1599_v53  ;;  %1626 = vpow2.f32 %v1247_v48 }
 0x147   :  { %v1603_v55 = vpop.eup %1602  ;;  %v880_v56 = vadd.f32 1.0, %v1601_v54  ;;  %1628 = vpow2.f32 %v1213_v50 }
 0x148   :  { %v1605_v57 = vpop.eup %1604  ;;  %v912_v58 = vadd.f32 1.0, %v1603_v55  ;;  %1630 = vpow2.f32 %v1245_v52 }
 0x149   :  { %v1607_v59 = vpop.eup %1606  ;;  %1632 = vrcp.f32 %v880_v56  ;;  %v878_v60 = vadd.f32 1.0, %v1605_v57 }
 0x14a   :  { %v1609_v61 = vpop.eup %1608  ;;  %1634 = vrcp.f32 %v912_v58  ;;  %v910_v62 = vadd.f32 1.0, %v1607_v59 }
 0x14b   :  { %v1611_v63 = vpop.eup %1610  ;;  %1636 = vrcp.f32 %v878_v60  ;;  %v881_v0 = vadd.f32 1.0, %v1609_v61 }
 0x14c   :  { %v1613_v1 = vpop.eup %1612  ;;  %1638 = vrcp.f32 %v910_v62  ;;  %v913_v2 = vadd.f32 1.0, %v1611_v63 }
 0x14d   :  { %v1615_v3 = vpop.eup %1614  ;;  %1640 = vrcp.f32 %v881_v0  ;;  %v879_v4 = vadd.f32 1.0, %v1613_v1 }
 0x14e   :  { %v1617_v5 = vpop.eup %1616  ;;  %1642 = vrcp.f32 %v913_v2  ;;  %v911_v6 = vadd.f32 1.0, %v1615_v3 }
 0x14f   :  { %v1619_v7 = vpop.eup %1618  ;;  %1644 = vrcp.f32 %v879_v4  ;;  %v884_v8 = vadd.f32 1.0, %v1617_v5 }
 0x150   :  { %v1621_v9 = vpop.eup %1620  ;;  %1646 = vrcp.f32 %v911_v6  ;;  %v916_v10 = vadd.f32 1.0, %v1619_v7 }
 0x151   :  { %v1623_v11 = vpop.eup %1622  ;;  %1648 = vrcp.f32 %v884_v8  ;;  %v882_v12 = vadd.f32 1.0, %v1621_v9 }
 0x152   :  { %v1625_v13 = vpop.eup %1624  ;;  %1650 = vrcp.f32 %v916_v10  ;;  %v914_v14 = vadd.f32 1.0, %v1623_v11 }
 0x153   :  { %v1627_v15 = vpop.eup %1626  ;;  %1652 = vrcp.f32 %v882_v12  ;;  %v885_v16 = vadd.f32 1.0, %v1625_v13 }
 0x154   :  { %v1629_v17 = vpop.eup %1628  ;;  %1654 = vrcp.f32 %v914_v14  ;;  %v917_v18 = vadd.f32 1.0, %v1627_v15 }
 0x155   :  { %v1631_v19 = vpop.eup %1630  ;;  %1656 = vrcp.f32 %v885_v16  ;;  %v883_v20 = vadd.f32 1.0, %v1629_v17 }
 0x156   :  { %v1633_v21 = vpop.eup %1632  ;;  %1658 = vrcp.f32 %v917_v18  ;;  %v915_v22 = vadd.f32 1.0, %v1631_v19 }
 0x157   :  { %v1635_v23 = vpop.eup %1634  ;;  %1073 = vst.msk [vmem:[%s2080_s2 + $0xd0] sm:$0xff] %vm1046_vm2, %v1633_v21  ;;  %1660 = vrcp.f32 %v883_v20 }
 0x158   :  { %v1637_v24 = vpop.eup %1636  ;;  %1105 = vst.msk [vmem:[%s2080_s2 + $0x1d0] sm:$0xff] %vm1046_vm2, %v1635_v23  ;;  %1662 = vrcp.f32 %v915_v22 }
 0x159   :  { %v1639_v25 = vpop.eup %1638  ;;  %1071 = vst.msk [vmem:[%s2080_s2 + $0xc0] sm:$0xff] %vm1046_vm2, %v1637_v24 }
 0x15a   :  { %v1641_v26 = vpop.eup %1640  ;;  %1103 = vst.msk [vmem:[%s2080_s2 + $0x1c0] sm:$0xff] %vm1046_vm2, %v1639_v25 }
 0x15b   :  { %v1643_v27 = vpop.eup %1642  ;;  %1074 = vst.msk [vmem:[%s2080_s2 + $0xd8] sm:$0xff] %vm1046_vm2, %v1641_v26 }
 0x15c   :  { %v1645_v28 = vpop.eup %1644  ;;  %1106 = vst.msk [vmem:[%s2080_s2 + $0x1d8] sm:$0xff] %vm1046_vm2, %v1643_v27 }
 0x15d   :  { %v1647_v29 = vpop.eup %1646  ;;  %1072 = vst.msk [vmem:[%s2080_s2 + $0xc8] sm:$0xff] %vm1046_vm2, %v1645_v28 }
 0x15e   :  { %v1649_v30 = vpop.eup %1648  ;;  %1104 = vst.msk [vmem:[%s2080_s2 + $0x1c8] sm:$0xff] %vm1046_vm2, %v1647_v29 }
 0x15f   :  { %v1651_v31 = vpop.eup %1650  ;;  %1077 = vst.msk [vmem:[%s2080_s2 + $0xf0] sm:$0xff] %vm1046_vm2, %v1649_v30 }
 0x160   :  { %v1653_v32 = vpop.eup %1652  ;;  %1109 = vst.msk [vmem:[%s2080_s2 + $0x1f0] sm:$0xff] %vm1046_vm2, %v1651_v31 }
 0x161   :  { %v1655_v33 = vpop.eup %1654  ;;  %1075 = vst.msk [vmem:[%s2080_s2 + $0xe0] sm:$0xff] %vm1046_vm2, %v1653_v32 }
 0x162   :  { %v1657_v34 = vpop.eup %1656  ;;  %1107 = vst.msk [vmem:[%s2080_s2 + $0x1e0] sm:$0xff] %vm1046_vm2, %v1655_v33 }
 0x163   :  { %v1659_v35 = vpop.eup %1658  ;;  %1078 = vst.msk [vmem:[%s2080_s2 + $0xf8] sm:$0xff] %vm1046_vm2, %v1657_v34 }
 0x164   :  { %v1661_v36 = vpop.eup %1660  ;;  %1110 = vst.msk [vmem:[%s2080_s2 + $0x1f8] sm:$0xff] %vm1046_vm2, %v1659_v35 }
 0x165   :  { %v1663_v37 = vpop.eup %1662  ;;  %1076 = vst.msk [vmem:[%s2080_s2 + $0xe8] sm:$0xff] %vm1046_vm2, %v1661_v36 }
 0x166   :  { %1108 = vst.msk [vmem:[%s2080_s2 + $0x1e8] sm:$0xff] %vm1046_vm2, %v1663_v37 }

</bundles_post_ra>
